<compile_context>
chip_gen: v7x
topology: tpu7x:2x2x1
jax: 0.10.0
libtpu: 0.0.40
codegen_flags: <defaults>
</compile_context>

<pallas_src>
import functools

import jax
import jax.numpy as jnp
from jax import lax
from jax.experimental import pallas as pl
from jax.experimental.pallas import tpu as pltpu


# ---------------------------------------------------------------------------
# Fused Pallas kernel: one grid step = one batch element
# ---------------------------------------------------------------------------

def _hin_res_block_kernel(x_ref, m_ref, w1_ref, b1_ref, w2_ref, b2_ref,
                          g_ref, bt_ref, o_ref, *, W, slope, eps):
    # x_ref : (1, C, P) f32   channel-major, P = H*W on lanes
    # m_ref : (9, 1, P) bf16  precomputed boundary masks (tap-major, 0/1)
    # w*_ref: (9, C, C) bf16  per-tap weight matrices (tap t = ky*3 + kx)
    # b*_ref: (C, 1)   f32    conv biases
    # g_ref/bt_ref: (C//2, 1) f32  HIN affine params
    # o_ref : (1, C, P) f32
    C = x_ref.shape[1]
    P = x_ref.shape[2]
    Ch = g_ref.shape[0]
    x = x_ref[0]                                              # (C, P)

    # Tap offsets in flattened row-major lane coordinates (static Python ints).
    offs = tuple(dy * W + dx for dy in (-1, 0, 1) for dx in (-1, 0, 1))

    def conv3x3(z, w_ref_, b_ref_):
        # z: (C, P) f32 -> (C, P) f32.
        # 9 per-tap matmuls (K=C each) accumulated in f32; shifts on the XLU
        # (pltpu.roll), masking in bf16, no im2col matrix materialized.
        acc = None
        for t, off in enumerate(offs):
            shifted = z if off == 0 else pltpu.roll(z, shift=(-off) % P, axis=1)
            col = shifted.astype(jnp.bfloat16)
            if off != 0:                       # center tap mask is all-ones
                col = col * m_ref[t]           # (C, P) * (1, P) bf16
            part = jnp.dot(w_ref_[t], col, preferred_element_type=jnp.float32)
            acc = part if acc is None else acc + part
        return acc + b_ref_[...]               # + (C, 1) bias

    def lrelu(z):
        return jnp.where(z >= 0, z, slope * z)

    # conv_1 + LeakyReLU
    t1 = lrelu(conv3x3(x, w1_ref, b1_ref))

    # Half-Instance-Norm on the first C//2 channels only (single-pass var).
    t1h = t1[:Ch]                                             # (Ch, P)
    mu = jnp.mean(t1h, axis=1, keepdims=True)                 # (Ch, 1)
    ex2 = jnp.mean(t1h * t1h, axis=1, keepdims=True)
    var = ex2 - mu * mu
    t1n = (t1h - mu) * lax.rsqrt(var + eps) * g_ref[...] + bt_ref[...]
    mid = jnp.concatenate([t1n, t1[Ch:]], axis=0)             # cat([norm, raw])

    # conv_2 + LeakyReLU + residual
    o_ref[0] = x + lrelu(conv3x3(mid, w2_ref, b2_ref))


# ---------------------------------------------------------------------------
# Wrapper
# ---------------------------------------------------------------------------

@functools.partial(jax.jit, static_argnames=("relu_slope", "eps"))
def hin_res_block_forward(x, params, *, relu_slope=0.2, eps=1e-5):
    # x: (B, C, H, W) float32 NCHW (as in PyTorch); in_size == out_size == C.
    B, C, H, W = x.shape
    P = H * W
    Ch = C // 2
    assert C % 2 == 0, "Half-Instance-Norm needs an even channel count"
    assert P % 128 == 0, "H*W must be a multiple of 128 for lane-dense tiles"

    # NCHW is already channel-major: pure reshape, no transpose.
    x_flat = x.reshape(B, C, P)

    # (Cout, Cin, 3, 3) -> (9, Cout, Cin) bf16, tap index t = ky*3 + kx.
    def per_tap(w):
        return jnp.transpose(w, (2, 3, 0, 1)).reshape(9, C, C).astype(jnp.bfloat16)

    w1_t = per_tap(params["w1"])
    w2_t = per_tap(params["w2"])
    b1_col = params["b1"].reshape(C, 1).astype(jnp.float32)
    b2_col = params["b2"].reshape(C, 1).astype(jnp.float32)
    g_col = params["norm_w"].reshape(Ch, 1).astype(jnp.float32)
    bt_col = params["norm_b"].reshape(Ch, 1).astype(jnp.float32)

    # Precompute the 9 boundary masks once (shared by both convs, all steps).
    p_idx = jnp.arange(P, dtype=jnp.int32)
    y_idx = p_idx // W
    x_idx = p_idx % W
    masks = []
    for dy in (-1, 0, 1):
        for dx in (-1, 0, 1):
            valid = ((y_idx + dy >= 0) & (y_idx + dy < H) &
                     (x_idx + dx >= 0) & (x_idx + dx < W))
            masks.append(valid)
    masks = jnp.stack(masks, axis=0).reshape(9, 1, P).astype(jnp.bfloat16)

    kernel = functools.partial(_hin_res_block_kernel, W=W,
                               slope=relu_slope, eps=eps)

    # VMEM budget: double-buffered in/out blocks + ~10 live (C, P) f32 temps.
    vmem_bytes = int(min(max(14 * C * P * 4 + 9 * P * 2 + 4 * 9 * C * C * 2,
                             4 << 20), 64 << 20))

    flops = 2 * B * (2 * C * (9 * C) * P)                 # two 3x3 convs/image
    bytes_accessed = 2 * B * C * P * 4 + 2 * 9 * C * C * 2 + 9 * P * 2

    out = pl.pallas_call(
        kernel,
        out_shape=jax.ShapeDtypeStruct((B, C, P), jnp.float32),
        grid=(B,),
        in_specs=[
            pl.BlockSpec((1, C, P), lambda i: (i, 0, 0)),
            pl.BlockSpec((9, 1, P), lambda i: (0, 0, 0)),
            pl.BlockSpec((9, C, C), lambda i: (0, 0, 0)),
            pl.BlockSpec((C, 1), lambda i: (0, 0)),
            pl.BlockSpec((9, C, C), lambda i: (0, 0, 0)),
            pl.BlockSpec((C, 1), lambda i: (0, 0)),
            pl.BlockSpec((Ch, 1), lambda i: (0, 0)),
            pl.BlockSpec((Ch, 1), lambda i: (0, 0)),
        ],
        out_specs=pl.BlockSpec((1, C, P), lambda i: (i, 0, 0)),
        compiler_params=pltpu.CompilerParams(
            dimension_semantics=("parallel",),
            vmem_limit_bytes=vmem_bytes),
        cost_estimate=pl.CostEstimate(
            flops=flops, transcendentals=B * Ch,
            bytes_accessed=bytes_accessed),
    )(x_flat, masks, w1_t, b1_col, w2_t, b2_col, g_col, bt_col)

    return out.reshape(B, C, H, W)


# ---------------------------------------------------------------------------
# Pure-JAX reference (for correctness check)
# ---------------------------------------------------------------------------

def reference_forward(x, params, relu_slope=0.2, eps=1e-5):
    B, C, H, W = x.shape
    dn = ("NCHW", "OIHW", "NCHW")

    def conv3x3(z, w, b):
        y = lax.conv_general_dilated(z, w, (1, 1), ((1, 1), (1, 1)),
                                     dimension_numbers=dn)
        return y + b[None, :, None, None]

    def lrelu(z):
        return jnp.where(z >= 0, z, relu_slope * z)

    r = lrelu(conv3x3(x, params["w1"], params["b1"]))
    h = C // 2
    o1, o2 = r[:, :h], r[:, h:]
    mu = jnp.mean(o1, axis=(2, 3), keepdims=True)
    var = jnp.var(o1, axis=(2, 3), keepdims=True)             # biased, as torch
    o1n = (o1 - mu) / jnp.sqrt(var + eps)
    o1n = (o1n * params["norm_w"][None, :, None, None]
           + params["norm_b"][None, :, None, None])
    r = jnp.concatenate([o1n, o2], axis=1)
    r = lrelu(conv3x3(r, params["w2"], params["b2"]))
    return x + r


# ---------------------------------------------------------------------------
# Main
# ---------------------------------------------------------------------------

if __name__ == "__main__":
    B, C, H, W = 2, 8, 16, 16          # in_size == out_size == 8 (residual add)
    wscale = (9.0 * C) ** -0.5

    key = jax.random.PRNGKey(0)
    ks = jax.random.split(key, 7)
    params = {
        "w1": jax.random.normal(ks[0], (C, C, 3, 3), jnp.float32) * wscale,
        "b1": jax.random.normal(ks[1], (C,), jnp.float32) * 0.1,
        "w2": jax.random.normal(ks[2], (C, C, 3, 3), jnp.float32) * wscale,
        "b2": jax.random.normal(ks[3], (C,), jnp.float32) * 0.1,
        "norm_w": 1.0 + 0.1 * jax.random.normal(ks[4], (C // 2,), jnp.float32),
        "norm_b": 0.1 * jax.random.normal(ks[5], (C // 2,), jnp.float32),
    }
    x = jax.random.normal(ks[6], (B, C, H, W), jnp.float32)

    out = jax.block_until_ready(hin_res_block_forward(x, params))
    ref = jax.block_until_ready(reference_forward(x, params))

    assert out.shape == (B, C, H, W)
    err = float(jnp.max(jnp.abs(out - ref) / (1.0 + jnp.abs(ref))))
    assert err < 2e-2, f"mismatch vs reference: rel err {err}"

    print("KERNEL_OK")
</pallas_src>

<mosaic_0001>
module attributes {stable_mosaic.version = 11 : i64} {
  func.func @_hin_res_block_kernel(%arg0: i32, %arg1: memref<1x8x256xf32, #tpu.memory_space<vmem>>, %arg2: memref<9x1x256xbf16, #tpu.memory_space<vmem>>, %arg3: memref<9x8x8xbf16, #tpu.memory_space<vmem>>, %arg4: memref<8x1xf32, #tpu.memory_space<vmem>>, %arg5: memref<9x8x8xbf16, #tpu.memory_space<vmem>>, %arg6: memref<8x1xf32, #tpu.memory_space<vmem>>, %arg7: memref<4x1xf32, #tpu.memory_space<vmem>>, %arg8: memref<4x1xf32, #tpu.memory_space<vmem>>, %arg9: memref<1x8x256xf32, #tpu.memory_space<vmem>>) attributes {dimension_semantics = [#tpu.dimension_semantics<parallel>], iteration_bounds = array<i64: 2>, scalar_prefetch = 0 : i64, scratch_operands = 0 : i64, tpu.core_type = #tpu.core_type<tc>, window_params = [{transform_indices = @transform_0, window_bounds = array<i64: 1, 8, 256>}, {pipeline_mode = #tpu.pipeline_mode<synchronous>, transform_indices = @transform_1, window_bounds = array<i64: 9, 1, 256>}, {pipeline_mode = #tpu.pipeline_mode<synchronous>, transform_indices = @transform_2, window_bounds = array<i64: 9, 8, 8>}, {pipeline_mode = #tpu.pipeline_mode<synchronous>, transform_indices = @transform_3, window_bounds = array<i64: 8, 1>}, {pipeline_mode = #tpu.pipeline_mode<synchronous>, transform_indices = @transform_4, window_bounds = array<i64: 9, 8, 8>}, {pipeline_mode = #tpu.pipeline_mode<synchronous>, transform_indices = @transform_5, window_bounds = array<i64: 8, 1>}, {pipeline_mode = #tpu.pipeline_mode<synchronous>, transform_indices = @transform_6, window_bounds = array<i64: 4, 1>}, {pipeline_mode = #tpu.pipeline_mode<synchronous>, transform_indices = @transform_7, window_bounds = array<i64: 4, 1>}, {transform_indices = @transform_8, window_bounds = array<i64: 1, 8, 256>}]} {
    %c0 = arith.constant 0 : index
    %c0_0 = arith.constant 0 : index
    %c0_1 = arith.constant 0 : index
    %0 = vector.load %arg1[%c0, %c0_0, %c0_1] : memref<1x8x256xf32, #tpu.memory_space<vmem>>, vector<1x8x256xf32>
    %1 = vector.shape_cast %0 : vector<1x8x256xf32> to vector<8x256xf32>
    %c17_i32 = arith.constant 17 : i32
    %2 = tpu.dynamic_rotate %1 by %c17_i32 dim 1 : vector<8x256xf32>, i32 -> vector<8x256xf32>
    %3 = arith.truncf %2 : vector<8x256xf32> to vector<8x256xbf16>
    %c0_2 = arith.constant 0 : index
    %c0_3 = arith.constant 0 : index
    %c0_4 = arith.constant 0 : index
    %4 = vector.load %arg2[%c0_2, %c0_3, %c0_4] : memref<9x1x256xbf16, #tpu.memory_space<vmem>>, vector<1x1x256xbf16>
    %5 = vector.shape_cast %4 : vector<1x1x256xbf16> to vector<1x256xbf16>
    %6 = vector.broadcast %5 : vector<1x256xbf16> to vector<8x256xbf16>
    %7 = arith.mulf %3, %6 : vector<8x256xbf16>
    %c0_5 = arith.constant 0 : index
    %c0_6 = arith.constant 0 : index
    %c0_7 = arith.constant 0 : index
    %8 = vector.load %arg3[%c0_5, %c0_6, %c0_7] : memref<9x8x8xbf16, #tpu.memory_space<vmem>>, vector<1x8x8xbf16>
    %9 = vector.shape_cast %8 : vector<1x8x8xbf16> to vector<8x8xbf16>
    %cst = arith.constant dense<0.000000e+00> : vector<8x256xf32>
    %10 = tpu.matmul %9, %7, %cst {dimension_numbers = #tpu.dot_dimension_numbers<[1], [0], [0], [1], [0, 0, 1, 1], [], []>} : vector<8x8xbf16>, vector<8x256xbf16>, vector<8x256xf32> -> vector<8x256xf32>
    %c16_i32 = arith.constant 16 : i32
    %11 = tpu.dynamic_rotate %1 by %c16_i32 dim 1 : vector<8x256xf32>, i32 -> vector<8x256xf32>
    %12 = arith.truncf %11 : vector<8x256xf32> to vector<8x256xbf16>
    %c1 = arith.constant 1 : index
    %c0_8 = arith.constant 0 : index
    %c0_9 = arith.constant 0 : index
    %13 = vector.load %arg2[%c1, %c0_8, %c0_9] : memref<9x1x256xbf16, #tpu.memory_space<vmem>>, vector<1x1x256xbf16>
    %14 = vector.shape_cast %13 : vector<1x1x256xbf16> to vector<1x256xbf16>
    %15 = vector.broadcast %14 : vector<1x256xbf16> to vector<8x256xbf16>
    %16 = arith.mulf %12, %15 : vector<8x256xbf16>
    %c1_10 = arith.constant 1 : index
    %c0_11 = arith.constant 0 : index
    %c0_12 = arith.constant 0 : index
    %17 = vector.load %arg3[%c1_10, %c0_11, %c0_12] : memref<9x8x8xbf16, #tpu.memory_space<vmem>>, vector<1x8x8xbf16>
    %18 = vector.shape_cast %17 : vector<1x8x8xbf16> to vector<8x8xbf16>
    %cst_13 = arith.constant dense<0.000000e+00> : vector<8x256xf32>
    %19 = tpu.matmul %18, %16, %cst_13 {dimension_numbers = #tpu.dot_dimension_numbers<[1], [0], [0], [1], [0, 0, 1, 1], [], []>} : vector<8x8xbf16>, vector<8x256xbf16>, vector<8x256xf32> -> vector<8x256xf32>
    %20 = arith.addf %10, %19 : vector<8x256xf32>
    %c15_i32 = arith.constant 15 : i32
    %21 = tpu.dynamic_rotate %1 by %c15_i32 dim 1 : vector<8x256xf32>, i32 -> vector<8x256xf32>
    %22 = arith.truncf %21 : vector<8x256xf32> to vector<8x256xbf16>
    %c2 = arith.constant 2 : index
    %c0_14 = arith.constant 0 : index
    %c0_15 = arith.constant 0 : index
    %23 = vector.load %arg2[%c2, %c0_14, %c0_15] : memref<9x1x256xbf16, #tpu.memory_space<vmem>>, vector<1x1x256xbf16>
    %24 = vector.shape_cast %23 : vector<1x1x256xbf16> to vector<1x256xbf16>
    %25 = vector.broadcast %24 : vector<1x256xbf16> to vector<8x256xbf16>
    %26 = arith.mulf %22, %25 : vector<8x256xbf16>
    %c2_16 = arith.constant 2 : index
    %c0_17 = arith.constant 0 : index
    %c0_18 = arith.constant 0 : index
    %27 = vector.load %arg3[%c2_16, %c0_17, %c0_18] : memref<9x8x8xbf16, #tpu.memory_space<vmem>>, vector<1x8x8xbf16>
    %28 = vector.shape_cast %27 : vector<1x8x8xbf16> to vector<8x8xbf16>
    %cst_19 = arith.constant dense<0.000000e+00> : vector<8x256xf32>
    %29 = tpu.matmul %28, %26, %cst_19 {dimension_numbers = #tpu.dot_dimension_numbers<[1], [0], [0], [1], [0, 0, 1, 1], [], []>} : vector<8x8xbf16>, vector<8x256xbf16>, vector<8x256xf32> -> vector<8x256xf32>
    %30 = arith.addf %20, %29 : vector<8x256xf32>
    %c1_i32 = arith.constant 1 : i32
    %31 = tpu.dynamic_rotate %1 by %c1_i32 dim 1 : vector<8x256xf32>, i32 -> vector<8x256xf32>
    %32 = arith.truncf %31 : vector<8x256xf32> to vector<8x256xbf16>
    %c3 = arith.constant 3 : index
    %c0_20 = arith.constant 0 : index
    %c0_21 = arith.constant 0 : index
    %33 = vector.load %arg2[%c3, %c0_20, %c0_21] : memref<9x1x256xbf16, #tpu.memory_space<vmem>>, vector<1x1x256xbf16>
    %34 = vector.shape_cast %33 : vector<1x1x256xbf16> to vector<1x256xbf16>
    %35 = vector.broadcast %34 : vector<1x256xbf16> to vector<8x256xbf16>
    %36 = arith.mulf %32, %35 : vector<8x256xbf16>
    %c3_22 = arith.constant 3 : index
    %c0_23 = arith.constant 0 : index
    %c0_24 = arith.constant 0 : index
    %37 = vector.load %arg3[%c3_22, %c0_23, %c0_24] : memref<9x8x8xbf16, #tpu.memory_space<vmem>>, vector<1x8x8xbf16>
    %38 = vector.shape_cast %37 : vector<1x8x8xbf16> to vector<8x8xbf16>
    %cst_25 = arith.constant dense<0.000000e+00> : vector<8x256xf32>
    %39 = tpu.matmul %38, %36, %cst_25 {dimension_numbers = #tpu.dot_dimension_numbers<[1], [0], [0], [1], [0, 0, 1, 1], [], []>} : vector<8x8xbf16>, vector<8x256xbf16>, vector<8x256xf32> -> vector<8x256xf32>
    %40 = arith.addf %30, %39 : vector<8x256xf32>
    %41 = arith.truncf %1 : vector<8x256xf32> to vector<8x256xbf16>
    %c4 = arith.constant 4 : index
    %c0_26 = arith.constant 0 : index
    %c0_27 = arith.constant 0 : index
    %42 = vector.load %arg3[%c4, %c0_26, %c0_27] : memref<9x8x8xbf16, #tpu.memory_space<vmem>>, vector<1x8x8xbf16>
    %43 = vector.shape_cast %42 : vector<1x8x8xbf16> to vector<8x8xbf16>
    %cst_28 = arith.constant dense<0.000000e+00> : vector<8x256xf32>
    %44 = tpu.matmul %43, %41, %cst_28 {dimension_numbers = #tpu.dot_dimension_numbers<[1], [0], [0], [1], [0, 0, 1, 1], [], []>} : vector<8x8xbf16>, vector<8x256xbf16>, vector<8x256xf32> -> vector<8x256xf32>
    %45 = arith.addf %40, %44 : vector<8x256xf32>
    %c255_i32 = arith.constant 255 : i32
    %46 = tpu.dynamic_rotate %1 by %c255_i32 dim 1 : vector<8x256xf32>, i32 -> vector<8x256xf32>
    %47 = arith.truncf %46 : vector<8x256xf32> to vector<8x256xbf16>
    %c5 = arith.constant 5 : index
    %c0_29 = arith.constant 0 : index
    %c0_30 = arith.constant 0 : index
    %48 = vector.load %arg2[%c5, %c0_29, %c0_30] : memref<9x1x256xbf16, #tpu.memory_space<vmem>>, vector<1x1x256xbf16>
    %49 = vector.shape_cast %48 : vector<1x1x256xbf16> to vector<1x256xbf16>
    %50 = vector.broadcast %49 : vector<1x256xbf16> to vector<8x256xbf16>
    %51 = arith.mulf %47, %50 : vector<8x256xbf16>
    %c5_31 = arith.constant 5 : index
    %c0_32 = arith.constant 0 : index
    %c0_33 = arith.constant 0 : index
    %52 = vector.load %arg3[%c5_31, %c0_32, %c0_33] : memref<9x8x8xbf16, #tpu.memory_space<vmem>>, vector<1x8x8xbf16>
    %53 = vector.shape_cast %52 : vector<1x8x8xbf16> to vector<8x8xbf16>
    %cst_34 = arith.constant dense<0.000000e+00> : vector<8x256xf32>
    %54 = tpu.matmul %53, %51, %cst_34 {dimension_numbers = #tpu.dot_dimension_numbers<[1], [0], [0], [1], [0, 0, 1, 1], [], []>} : vector<8x8xbf16>, vector<8x256xbf16>, vector<8x256xf32> -> vector<8x256xf32>
    %55 = arith.addf %45, %54 : vector<8x256xf32>
    %c241_i32 = arith.constant 241 : i32
    %56 = tpu.dynamic_rotate %1 by %c241_i32 dim 1 : vector<8x256xf32>, i32 -> vector<8x256xf32>
    %57 = arith.truncf %56 : vector<8x256xf32> to vector<8x256xbf16>
    %c6 = arith.constant 6 : index
    %c0_35 = arith.constant 0 : index
    %c0_36 = arith.constant 0 : index
    %58 = vector.load %arg2[%c6, %c0_35, %c0_36] : memref<9x1x256xbf16, #tpu.memory_space<vmem>>, vector<1x1x256xbf16>
    %59 = vector.shape_cast %58 : vector<1x1x256xbf16> to vector<1x256xbf16>
    %60 = vector.broadcast %59 : vector<1x256xbf16> to vector<8x256xbf16>
    %61 = arith.mulf %57, %60 : vector<8x256xbf16>
    %c6_37 = arith.constant 6 : index
    %c0_38 = arith.constant 0 : index
    %c0_39 = arith.constant 0 : index
    %62 = vector.load %arg3[%c6_37, %c0_38, %c0_39] : memref<9x8x8xbf16, #tpu.memory_space<vmem>>, vector<1x8x8xbf16>
    %63 = vector.shape_cast %62 : vector<1x8x8xbf16> to vector<8x8xbf16>
    %cst_40 = arith.constant dense<0.000000e+00> : vector<8x256xf32>
    %64 = tpu.matmul %63, %61, %cst_40 {dimension_numbers = #tpu.dot_dimension_numbers<[1], [0], [0], [1], [0, 0, 1, 1], [], []>} : vector<8x8xbf16>, vector<8x256xbf16>, vector<8x256xf32> -> vector<8x256xf32>
    %65 = arith.addf %55, %64 : vector<8x256xf32>
    %c240_i32 = arith.constant 240 : i32
    %66 = tpu.dynamic_rotate %1 by %c240_i32 dim 1 : vector<8x256xf32>, i32 -> vector<8x256xf32>
    %67 = arith.truncf %66 : vector<8x256xf32> to vector<8x256xbf16>
    %c7 = arith.constant 7 : index
    %c0_41 = arith.constant 0 : index
    %c0_42 = arith.constant 0 : index
    %68 = vector.load %arg2[%c7, %c0_41, %c0_42] : memref<9x1x256xbf16, #tpu.memory_space<vmem>>, vector<1x1x256xbf16>
    %69 = vector.shape_cast %68 : vector<1x1x256xbf16> to vector<1x256xbf16>
    %70 = vector.broadcast %69 : vector<1x256xbf16> to vector<8x256xbf16>
    %71 = arith.mulf %67, %70 : vector<8x256xbf16>
    %c7_43 = arith.constant 7 : index
    %c0_44 = arith.constant 0 : index
    %c0_45 = arith.constant 0 : index
    %72 = vector.load %arg3[%c7_43, %c0_44, %c0_45] : memref<9x8x8xbf16, #tpu.memory_space<vmem>>, vector<1x8x8xbf16>
    %73 = vector.shape_cast %72 : vector<1x8x8xbf16> to vector<8x8xbf16>
    %cst_46 = arith.constant dense<0.000000e+00> : vector<8x256xf32>
    %74 = tpu.matmul %73, %71, %cst_46 {dimension_numbers = #tpu.dot_dimension_numbers<[1], [0], [0], [1], [0, 0, 1, 1], [], []>} : vector<8x8xbf16>, vector<8x256xbf16>, vector<8x256xf32> -> vector<8x256xf32>
    %75 = arith.addf %65, %74 : vector<8x256xf32>
    %c239_i32 = arith.constant 239 : i32
    %76 = tpu.dynamic_rotate %1 by %c239_i32 dim 1 : vector<8x256xf32>, i32 -> vector<8x256xf32>
    %77 = arith.truncf %76 : vector<8x256xf32> to vector<8x256xbf16>
    %c8 = arith.constant 8 : index
    %c0_47 = arith.constant 0 : index
    %c0_48 = arith.constant 0 : index
    %78 = vector.load %arg2[%c8, %c0_47, %c0_48] : memref<9x1x256xbf16, #tpu.memory_space<vmem>>, vector<1x1x256xbf16>
    %79 = vector.shape_cast %78 : vector<1x1x256xbf16> to vector<1x256xbf16>
    %80 = vector.broadcast %79 : vector<1x256xbf16> to vector<8x256xbf16>
    %81 = arith.mulf %77, %80 : vector<8x256xbf16>
    %c8_49 = arith.constant 8 : index
    %c0_50 = arith.constant 0 : index
    %c0_51 = arith.constant 0 : index
    %82 = vector.load %arg3[%c8_49, %c0_50, %c0_51] : memref<9x8x8xbf16, #tpu.memory_space<vmem>>, vector<1x8x8xbf16>
    %83 = vector.shape_cast %82 : vector<1x8x8xbf16> to vector<8x8xbf16>
    %cst_52 = arith.constant dense<0.000000e+00> : vector<8x256xf32>
    %84 = tpu.matmul %83, %81, %cst_52 {dimension_numbers = #tpu.dot_dimension_numbers<[1], [0], [0], [1], [0, 0, 1, 1], [], []>} : vector<8x8xbf16>, vector<8x256xbf16>, vector<8x256xf32> -> vector<8x256xf32>
    %85 = arith.addf %75, %84 : vector<8x256xf32>
    %c0_53 = arith.constant 0 : index
    %c0_54 = arith.constant 0 : index
    %86 = vector.load %arg4[%c0_53, %c0_54] : memref<8x1xf32, #tpu.memory_space<vmem>>, vector<8x1xf32>
    %87 = vector.broadcast %86 : vector<8x1xf32> to vector<8x256xf32>
    %88 = arith.addf %85, %87 : vector<8x256xf32>
    %cst_55 = arith.constant 0.000000e+00 : f32
    %89 = vector.broadcast %cst_55 : f32 to vector<8x256xf32>
    %90 = arith.cmpf oge, %88, %89 : vector<8x256xf32>
    %cst_56 = arith.constant 2.000000e-01 : f32
    %91 = vector.broadcast %cst_56 : f32 to vector<8x256xf32>
    %92 = arith.mulf %91, %88 : vector<8x256xf32>
    %93 = arith.select %90, %88, %92 : vector<8x256xi1>, vector<8x256xf32>
    %94 = vector.extract_strided_slice %93 {offsets = [0, 0], sizes = [4, 256], strides = [1, 1]} : vector<8x256xf32> to vector<4x256xf32>
    %cst_57 = arith.constant dense<0.000000e+00> : vector<4xf32>
    %95 = vector.multi_reduction <add>, %94, %cst_57 [1] : vector<4x256xf32> to vector<4xf32>
    %96 = vector.shape_cast %95 : vector<4xf32> to vector<4x1xf32>
    %cst_58 = arith.constant 2.560000e+02 : f32
    %97 = vector.broadcast %cst_58 : f32 to vector<4x1xf32>
    %98 = arith.divf %96, %97 : vector<4x1xf32>
    %99 = arith.mulf %94, %94 : vector<4x256xf32>
    %cst_59 = arith.constant dense<0.000000e+00> : vector<4xf32>
    %100 = vector.multi_reduction <add>, %99, %cst_59 [1] : vector<4x256xf32> to vector<4xf32>
    %101 = vector.shape_cast %100 : vector<4xf32> to vector<4x1xf32>
    %cst_60 = arith.constant 2.560000e+02 : f32
    %102 = vector.broadcast %cst_60 : f32 to vector<4x1xf32>
    %103 = arith.divf %101, %102 : vector<4x1xf32>
    %104 = arith.mulf %98, %98 : vector<4x1xf32>
    %105 = arith.subf %103, %104 : vector<4x1xf32>
    %106 = vector.broadcast %98 : vector<4x1xf32> to vector<4x256xf32>
    %107 = arith.subf %94, %106 : vector<4x256xf32>
    %cst_61 = arith.constant 9.99999974E-6 : f32
    %108 = vector.broadcast %cst_61 : f32 to vector<4x1xf32>
    %109 = arith.addf %105, %108 : vector<4x1xf32>
    %110 = math.rsqrt %109 : vector<4x1xf32>
    %111 = vector.broadcast %110 : vector<4x1xf32> to vector<4x256xf32>
    %112 = arith.mulf %107, %111 : vector<4x256xf32>
    %c0_62 = arith.constant 0 : index
    %c0_63 = arith.constant 0 : index
    %113 = vector.load %arg7[%c0_62, %c0_63] : memref<4x1xf32, #tpu.memory_space<vmem>>, vector<4x1xf32>
    %114 = vector.broadcast %113 : vector<4x1xf32> to vector<4x256xf32>
    %115 = arith.mulf %112, %114 : vector<4x256xf32>
    %c0_64 = arith.constant 0 : index
    %c0_65 = arith.constant 0 : index
    %116 = vector.load %arg8[%c0_64, %c0_65] : memref<4x1xf32, #tpu.memory_space<vmem>>, vector<4x1xf32>
    %117 = vector.broadcast %116 : vector<4x1xf32> to vector<4x256xf32>
    %118 = arith.addf %115, %117 : vector<4x256xf32>
    %119 = vector.extract_strided_slice %93 {offsets = [4, 0], sizes = [4, 256], strides = [1, 1]} : vector<8x256xf32> to vector<4x256xf32>
    %120 = tpu.concatenate %118, %119 in 0 : vector<4x256xf32>, vector<4x256xf32> -> vector<8x256xf32>
    %c17_i32_66 = arith.constant 17 : i32
    %121 = tpu.dynamic_rotate %120 by %c17_i32_66 dim 1 : vector<8x256xf32>, i32 -> vector<8x256xf32>
    %122 = arith.truncf %121 : vector<8x256xf32> to vector<8x256xbf16>
    %c0_67 = arith.constant 0 : index
    %c0_68 = arith.constant 0 : index
    %c0_69 = arith.constant 0 : index
    %123 = vector.load %arg2[%c0_67, %c0_68, %c0_69] : memref<9x1x256xbf16, #tpu.memory_space<vmem>>, vector<1x1x256xbf16>
    %124 = vector.shape_cast %123 : vector<1x1x256xbf16> to vector<1x256xbf16>
    %125 = vector.broadcast %124 : vector<1x256xbf16> to vector<8x256xbf16>
    %126 = arith.mulf %122, %125 : vector<8x256xbf16>
    %c0_70 = arith.constant 0 : index
    %c0_71 = arith.constant 0 : index
    %c0_72 = arith.constant 0 : index
    %127 = vector.load %arg5[%c0_70, %c0_71, %c0_72] : memref<9x8x8xbf16, #tpu.memory_space<vmem>>, vector<1x8x8xbf16>
    %128 = vector.shape_cast %127 : vector<1x8x8xbf16> to vector<8x8xbf16>
    %cst_73 = arith.constant dense<0.000000e+00> : vector<8x256xf32>
    %129 = tpu.matmul %128, %126, %cst_73 {dimension_numbers = #tpu.dot_dimension_numbers<[1], [0], [0], [1], [0, 0, 1, 1], [], []>} : vector<8x8xbf16>, vector<8x256xbf16>, vector<8x256xf32> -> vector<8x256xf32>
    %c16_i32_74 = arith.constant 16 : i32
    %130 = tpu.dynamic_rotate %120 by %c16_i32_74 dim 1 : vector<8x256xf32>, i32 -> vector<8x256xf32>
    %131 = arith.truncf %130 : vector<8x256xf32> to vector<8x256xbf16>
    %c1_75 = arith.constant 1 : index
    %c0_76 = arith.constant 0 : index
    %c0_77 = arith.constant 0 : index
    %132 = vector.load %arg2[%c1_75, %c0_76, %c0_77] : memref<9x1x256xbf16, #tpu.memory_space<vmem>>, vector<1x1x256xbf16>
    %133 = vector.shape_cast %132 : vector<1x1x256xbf16> to vector<1x256xbf16>
    %134 = vector.broadcast %133 : vector<1x256xbf16> to vector<8x256xbf16>
    %135 = arith.mulf %131, %134 : vector<8x256xbf16>
    %c1_78 = arith.constant 1 : index
    %c0_79 = arith.constant 0 : index
    %c0_80 = arith.constant 0 : index
    %136 = vector.load %arg5[%c1_78, %c0_79, %c0_80] : memref<9x8x8xbf16, #tpu.memory_space<vmem>>, vector<1x8x8xbf16>
    %137 = vector.shape_cast %136 : vector<1x8x8xbf16> to vector<8x8xbf16>
    %cst_81 = arith.constant dense<0.000000e+00> : vector<8x256xf32>
    %138 = tpu.matmul %137, %135, %cst_81 {dimension_numbers = #tpu.dot_dimension_numbers<[1], [0], [0], [1], [0, 0, 1, 1], [], []>} : vector<8x8xbf16>, vector<8x256xbf16>, vector<8x256xf32> -> vector<8x256xf32>
    %139 = arith.addf %129, %138 : vector<8x256xf32>
    %c15_i32_82 = arith.constant 15 : i32
    %140 = tpu.dynamic_rotate %120 by %c15_i32_82 dim 1 : vector<8x256xf32>, i32 -> vector<8x256xf32>
    %141 = arith.truncf %140 : vector<8x256xf32> to vector<8x256xbf16>
    %c2_83 = arith.constant 2 : index
    %c0_84 = arith.constant 0 : index
    %c0_85 = arith.constant 0 : index
    %142 = vector.load %arg2[%c2_83, %c0_84, %c0_85] : memref<9x1x256xbf16, #tpu.memory_space<vmem>>, vector<1x1x256xbf16>
    %143 = vector.shape_cast %142 : vector<1x1x256xbf16> to vector<1x256xbf16>
    %144 = vector.broadcast %143 : vector<1x256xbf16> to vector<8x256xbf16>
    %145 = arith.mulf %141, %144 : vector<8x256xbf16>
    %c2_86 = arith.constant 2 : index
    %c0_87 = arith.constant 0 : index
    %c0_88 = arith.constant 0 : index
    %146 = vector.load %arg5[%c2_86, %c0_87, %c0_88] : memref<9x8x8xbf16, #tpu.memory_space<vmem>>, vector<1x8x8xbf16>
    %147 = vector.shape_cast %146 : vector<1x8x8xbf16> to vector<8x8xbf16>
    %cst_89 = arith.constant dense<0.000000e+00> : vector<8x256xf32>
    %148 = tpu.matmul %147, %145, %cst_89 {dimension_numbers = #tpu.dot_dimension_numbers<[1], [0], [0], [1], [0, 0, 1, 1], [], []>} : vector<8x8xbf16>, vector<8x256xbf16>, vector<8x256xf32> -> vector<8x256xf32>
    %149 = arith.addf %139, %148 : vector<8x256xf32>
    %c1_i32_90 = arith.constant 1 : i32
    %150 = tpu.dynamic_rotate %120 by %c1_i32_90 dim 1 : vector<8x256xf32>, i32 -> vector<8x256xf32>
    %151 = arith.truncf %150 : vector<8x256xf32> to vector<8x256xbf16>
    %c3_91 = arith.constant 3 : index
    %c0_92 = arith.constant 0 : index
    %c0_93 = arith.constant 0 : index
    %152 = vector.load %arg2[%c3_91, %c0_92, %c0_93] : memref<9x1x256xbf16, #tpu.memory_space<vmem>>, vector<1x1x256xbf16>
    %153 = vector.shape_cast %152 : vector<1x1x256xbf16> to vector<1x256xbf16>
    %154 = vector.broadcast %153 : vector<1x256xbf16> to vector<8x256xbf16>
    %155 = arith.mulf %151, %154 : vector<8x256xbf16>
    %c3_94 = arith.constant 3 : index
    %c0_95 = arith.constant 0 : index
    %c0_96 = arith.constant 0 : index
    %156 = vector.load %arg5[%c3_94, %c0_95, %c0_96] : memref<9x8x8xbf16, #tpu.memory_space<vmem>>, vector<1x8x8xbf16>
    %157 = vector.shape_cast %156 : vector<1x8x8xbf16> to vector<8x8xbf16>
    %cst_97 = arith.constant dense<0.000000e+00> : vector<8x256xf32>
    %158 = tpu.matmul %157, %155, %cst_97 {dimension_numbers = #tpu.dot_dimension_numbers<[1], [0], [0], [1], [0, 0, 1, 1], [], []>} : vector<8x8xbf16>, vector<8x256xbf16>, vector<8x256xf32> -> vector<8x256xf32>
    %159 = arith.addf %149, %158 : vector<8x256xf32>
    %160 = arith.truncf %120 : vector<8x256xf32> to vector<8x256xbf16>
    %c4_98 = arith.constant 4 : index
    %c0_99 = arith.constant 0 : index
    %c0_100 = arith.constant 0 : index
    %161 = vector.load %arg5[%c4_98, %c0_99, %c0_100] : memref<9x8x8xbf16, #tpu.memory_space<vmem>>, vector<1x8x8xbf16>
    %162 = vector.shape_cast %161 : vector<1x8x8xbf16> to vector<8x8xbf16>
    %cst_101 = arith.constant dense<0.000000e+00> : vector<8x256xf32>
    %163 = tpu.matmul %162, %160, %cst_101 {dimension_numbers = #tpu.dot_dimension_numbers<[1], [0], [0], [1], [0, 0, 1, 1], [], []>} : vector<8x8xbf16>, vector<8x256xbf16>, vector<8x256xf32> -> vector<8x256xf32>
    %164 = arith.addf %159, %163 : vector<8x256xf32>
    %c255_i32_102 = arith.constant 255 : i32
    %165 = tpu.dynamic_rotate %120 by %c255_i32_102 dim 1 : vector<8x256xf32>, i32 -> vector<8x256xf32>
    %166 = arith.truncf %165 : vector<8x256xf32> to vector<8x256xbf16>
    %c5_103 = arith.constant 5 : index
    %c0_104 = arith.constant 0 : index
    %c0_105 = arith.constant 0 : index
    %167 = vector.load %arg2[%c5_103, %c0_104, %c0_105] : memref<9x1x256xbf16, #tpu.memory_space<vmem>>, vector<1x1x256xbf16>
    %168 = vector.shape_cast %167 : vector<1x1x256xbf16> to vector<1x256xbf16>
    %169 = vector.broadcast %168 : vector<1x256xbf16> to vector<8x256xbf16>
    %170 = arith.mulf %166, %169 : vector<8x256xbf16>
    %c5_106 = arith.constant 5 : index
    %c0_107 = arith.constant 0 : index
    %c0_108 = arith.constant 0 : index
    %171 = vector.load %arg5[%c5_106, %c0_107, %c0_108] : memref<9x8x8xbf16, #tpu.memory_space<vmem>>, vector<1x8x8xbf16>
    %172 = vector.shape_cast %171 : vector<1x8x8xbf16> to vector<8x8xbf16>
    %cst_109 = arith.constant dense<0.000000e+00> : vector<8x256xf32>
    %173 = tpu.matmul %172, %170, %cst_109 {dimension_numbers = #tpu.dot_dimension_numbers<[1], [0], [0], [1], [0, 0, 1, 1], [], []>} : vector<8x8xbf16>, vector<8x256xbf16>, vector<8x256xf32> -> vector<8x256xf32>
    %174 = arith.addf %164, %173 : vector<8x256xf32>
    %c241_i32_110 = arith.constant 241 : i32
    %175 = tpu.dynamic_rotate %120 by %c241_i32_110 dim 1 : vector<8x256xf32>, i32 -> vector<8x256xf32>
    %176 = arith.truncf %175 : vector<8x256xf32> to vector<8x256xbf16>
    %c6_111 = arith.constant 6 : index
    %c0_112 = arith.constant 0 : index
    %c0_113 = arith.constant 0 : index
    %177 = vector.load %arg2[%c6_111, %c0_112, %c0_113] : memref<9x1x256xbf16, #tpu.memory_space<vmem>>, vector<1x1x256xbf16>
    %178 = vector.shape_cast %177 : vector<1x1x256xbf16> to vector<1x256xbf16>
    %179 = vector.broadcast %178 : vector<1x256xbf16> to vector<8x256xbf16>
    %180 = arith.mulf %176, %179 : vector<8x256xbf16>
    %c6_114 = arith.constant 6 : index
    %c0_115 = arith.constant 0 : index
    %c0_116 = arith.constant 0 : index
    %181 = vector.load %arg5[%c6_114, %c0_115, %c0_116] : memref<9x8x8xbf16, #tpu.memory_space<vmem>>, vector<1x8x8xbf16>
    %182 = vector.shape_cast %181 : vector<1x8x8xbf16> to vector<8x8xbf16>
    %cst_117 = arith.constant dense<0.000000e+00> : vector<8x256xf32>
    %183 = tpu.matmul %182, %180, %cst_117 {dimension_numbers = #tpu.dot_dimension_numbers<[1], [0], [0], [1], [0, 0, 1, 1], [], []>} : vector<8x8xbf16>, vector<8x256xbf16>, vector<8x256xf32> -> vector<8x256xf32>
    %184 = arith.addf %174, %183 : vector<8x256xf32>
    %c240_i32_118 = arith.constant 240 : i32
    %185 = tpu.dynamic_rotate %120 by %c240_i32_118 dim 1 : vector<8x256xf32>, i32 -> vector<8x256xf32>
    %186 = arith.truncf %185 : vector<8x256xf32> to vector<8x256xbf16>
    %c7_119 = arith.constant 7 : index
    %c0_120 = arith.constant 0 : index
    %c0_121 = arith.constant 0 : index
    %187 = vector.load %arg2[%c7_119, %c0_120, %c0_121] : memref<9x1x256xbf16, #tpu.memory_space<vmem>>, vector<1x1x256xbf16>
    %188 = vector.shape_cast %187 : vector<1x1x256xbf16> to vector<1x256xbf16>
    %189 = vector.broadcast %188 : vector<1x256xbf16> to vector<8x256xbf16>
    %190 = arith.mulf %186, %189 : vector<8x256xbf16>
    %c7_122 = arith.constant 7 : index
    %c0_123 = arith.constant 0 : index
    %c0_124 = arith.constant 0 : index
    %191 = vector.load %arg5[%c7_122, %c0_123, %c0_124] : memref<9x8x8xbf16, #tpu.memory_space<vmem>>, vector<1x8x8xbf16>
    %192 = vector.shape_cast %191 : vector<1x8x8xbf16> to vector<8x8xbf16>
    %cst_125 = arith.constant dense<0.000000e+00> : vector<8x256xf32>
    %193 = tpu.matmul %192, %190, %cst_125 {dimension_numbers = #tpu.dot_dimension_numbers<[1], [0], [0], [1], [0, 0, 1, 1], [], []>} : vector<8x8xbf16>, vector<8x256xbf16>, vector<8x256xf32> -> vector<8x256xf32>
    %194 = arith.addf %184, %193 : vector<8x256xf32>
    %c239_i32_126 = arith.constant 239 : i32
    %195 = tpu.dynamic_rotate %120 by %c239_i32_126 dim 1 : vector<8x256xf32>, i32 -> vector<8x256xf32>
    %196 = arith.truncf %195 : vector<8x256xf32> to vector<8x256xbf16>
    %c8_127 = arith.constant 8 : index
    %c0_128 = arith.constant 0 : index
    %c0_129 = arith.constant 0 : index
    %197 = vector.load %arg2[%c8_127, %c0_128, %c0_129] : memref<9x1x256xbf16, #tpu.memory_space<vmem>>, vector<1x1x256xbf16>
    %198 = vector.shape_cast %197 : vector<1x1x256xbf16> to vector<1x256xbf16>
    %199 = vector.broadcast %198 : vector<1x256xbf16> to vector<8x256xbf16>
    %200 = arith.mulf %196, %199 : vector<8x256xbf16>
    %c8_130 = arith.constant 8 : index
    %c0_131 = arith.constant 0 : index
    %c0_132 = arith.constant 0 : index
    %201 = vector.load %arg5[%c8_130, %c0_131, %c0_132] : memref<9x8x8xbf16, #tpu.memory_space<vmem>>, vector<1x8x8xbf16>
    %202 = vector.shape_cast %201 : vector<1x8x8xbf16> to vector<8x8xbf16>
    %cst_133 = arith.constant dense<0.000000e+00> : vector<8x256xf32>
    %203 = tpu.matmul %202, %200, %cst_133 {dimension_numbers = #tpu.dot_dimension_numbers<[1], [0], [0], [1], [0, 0, 1, 1], [], []>} : vector<8x8xbf16>, vector<8x256xbf16>, vector<8x256xf32> -> vector<8x256xf32>
    %204 = arith.addf %194, %203 : vector<8x256xf32>
    %c0_134 = arith.constant 0 : index
    %c0_135 = arith.constant 0 : index
    %205 = vector.load %arg6[%c0_134, %c0_135] : memref<8x1xf32, #tpu.memory_space<vmem>>, vector<8x1xf32>
    %206 = vector.broadcast %205 : vector<8x1xf32> to vector<8x256xf32>
    %207 = arith.addf %204, %206 : vector<8x256xf32>
    %cst_136 = arith.constant 0.000000e+00 : f32
    %208 = vector.broadcast %cst_136 : f32 to vector<8x256xf32>
    %209 = arith.cmpf oge, %207, %208 : vector<8x256xf32>
    %cst_137 = arith.constant 2.000000e-01 : f32
    %210 = vector.broadcast %cst_137 : f32 to vector<8x256xf32>
    %211 = arith.mulf %210, %207 : vector<8x256xf32>
    %212 = arith.select %209, %207, %211 : vector<8x256xi1>, vector<8x256xf32>
    %213 = arith.addf %1, %212 : vector<8x256xf32>
    %c0_138 = arith.constant 0 : index
    %c0_139 = arith.constant 0 : index
    %c0_140 = arith.constant 0 : index
    %214 = vector.load %arg9[%c0_138, %c0_139, %c0_140] : memref<1x8x256xf32, #tpu.memory_space<vmem>>, vector<1x8x256xf32>
    %215 = vector.shape_cast %214 : vector<1x8x256xf32> to vector<8x256xf32>
    %216 = vector.shape_cast %213 : vector<8x256xf32> to vector<1x8x256xf32>
    tpu.vector_store %arg9[%c0_138, %c0_139, %c0_140], %216 {strides = array<i32>} : memref<1x8x256xf32, #tpu.memory_space<vmem>>, vector<1x8x256xf32>,
    return
  }
  func.func @transform_0(%arg0: i32) -> (i32, i32, i32) {
    %c0_i32 = arith.constant 0 : i32
    %c0_i32_0 = arith.constant 0 : i32
    %c0_i32_1 = arith.constant 0 : i32
    return %arg0, %c0_i32, %c0_i32_0 : i32, i32, i32
  }
  func.func @transform_1(%arg0: i32) -> (i32, i32, i32) {
    %c0_i32 = arith.constant 0 : i32
    %c0_i32_0 = arith.constant 0 : i32
    %c0_i32_1 = arith.constant 0 : i32
    %c0_i32_2 = arith.constant 0 : i32
    return %c0_i32, %c0_i32_0, %c0_i32_1 : i32, i32, i32
  }
  func.func @transform_2(%arg0: i32) -> (i32, i32, i32) {
    %c0_i32 = arith.constant 0 : i32
    %c0_i32_0 = arith.constant 0 : i32
    %c0_i32_1 = arith.constant 0 : i32
    %c0_i32_2 = arith.constant 0 : i32
    return %c0_i32, %c0_i32_0, %c0_i32_1 : i32, i32, i32
  }
  func.func @transform_3(%arg0: i32) -> (i32, i32) {
    %c0_i32 = arith.constant 0 : i32
    %c0_i32_0 = arith.constant 0 : i32
    %c0_i32_1 = arith.constant 0 : i32
    return %c0_i32, %c0_i32_0 : i32, i32
  }
  func.func @transform_4(%arg0: i32) -> (i32, i32, i32) {
    %c0_i32 = arith.constant 0 : i32
    %c0_i32_0 = arith.constant 0 : i32
    %c0_i32_1 = arith.constant 0 : i32
    %c0_i32_2 = arith.constant 0 : i32
    return %c0_i32, %c0_i32_0, %c0_i32_1 : i32, i32, i32
  }
  func.func @transform_5(%arg0: i32) -> (i32, i32) {
    %c0_i32 = arith.constant 0 : i32
    %c0_i32_0 = arith.constant 0 : i32
    %c0_i32_1 = arith.constant 0 : i32
    return %c0_i32, %c0_i32_0 : i32, i32
  }
  func.func @transform_6(%arg0: i32) -> (i32, i32) {
    %c0_i32 = arith.constant 0 : i32
    %c0_i32_0 = arith.constant 0 : i32
    %c0_i32_1 = arith.constant 0 : i32
    return %c0_i32, %c0_i32_0 : i32, i32
  }
  func.func @transform_7(%arg0: i32) -> (i32, i32) {
    %c0_i32 = arith.constant 0 : i32
    %c0_i32_0 = arith.constant 0 : i32
    %c0_i32_1 = arith.constant 0 : i32
    return %c0_i32, %c0_i32_0 : i32, i32
  }
  func.func @transform_8(%arg0: i32) -> (i32, i32, i32) {
    %c0_i32 = arith.constant 0 : i32
    %c0_i32_0 = arith.constant 0 : i32
    %c0_i32_1 = arith.constant 0 : i32
    return %arg0, %c0_i32, %c0_i32_0 : i32, i32, i32
  }
}

</mosaic_0001>

<bundles_post_ra>
// kernel: hin_res_block_forward.1
= control target key start
LH: loop header
LB: loop body
LE: loop exit
PB: predicated region body
PF: predicated region fallthrough
CT: control target
= control target key end

     0   :  { %s2133_s27 = smov 0   ;;  %s2573_s0 = inlined_call_operand.vmem [shape: f32[2,8,256], index: 0, kind: input, shape index: {}]   ;;  %s2574_s1 = inlined_call_operand.vmem [shape: bf16[9,1,256], index: 1, kind: input, shape index: {}]   ;;  %s2575_s2 = inlined_call_operand.vmem [shape: bf16[9,8,8], index: 2, kind: input, shape index: {}]   ;;  %s2576_s3 = inlined_call_operand.vmem [shape: f32[8,1], index: 3, kind: input, shape index: {}]   ;;  %s2577_s4 = inlined_call_operand.vmem [shape: bf16[9,8,8], index: 4, kind: input, shape index: {}]   ;;  %s2578_s5 = inlined_call_operand.vmem [shape: f32[8,1], index: 5, kind: input, shape index: {}]   ;;  %s2579_s6 = inlined_call_operand.vmem [shape: f32[4,1], index: 6, kind: input, shape index: {}]   ;;  %s2580_s7 = inlined_call_operand.vmem [shape: f32[4,1], index: 7, kind: input, shape index: {}]   ;;  %s2581_s8 = inlined_call_operand.vmem [shape: f32[2,8,256], index: 8, kind: output, shape index: {}]  }
   0x1 LB: > { %s1886_s28 = sadd.s32 4294967295, %s2076_s27   ;;  %p1890_p0 = scmp.ge.s32.totalorder %s2076_s27, 1  ;;  %s2076_s27 = sphi %s2133_s27, %s18_s27  }
   0x2   : > { %p262_p1 = scmp.lt.s32.totalorder %s2076_s27, 3 }
   0x4   : > { %p263_p2 = pnand %p1890_p0, %p262_p1 }
   0x5   : > { %p296_p3 = scmp.lt.s32.totalorder (!%p263_p2), %s1886_s28, 1  ;;  %v2078_v0 = vmov (!%p263_p2), 0   ;;  %s2079_s11 = smov (!%p263_p2), 16   ;;  %v1195_v4 = vld [vmem:[%s2576_s3] sm:$0xff] (!%p263_p2)  ;;  %v313_v5 = vlaneseq (!%p263_p2)  ;;  %v2087_v6 = vmov (!%p263_p2), 1966171168  }
   0x6   : > { %266 = sbr.rel (%p263_p2) target bundleno = 951 (0x3b7), region = 52  ;;  %456 = vmatprep.mubr.bf16.mxu0 (!%p263_p2), %v2078_v0  ;;  %506 = vmatprep.mubr.bf16.mxu1 (!%p263_p2), %v2078_v0  ;;  %s2080_s12 = smov (!%p263_p2), 15   ;;  %v331_v7 = vunpack.c.l.s4 (!%p263_p2), %v2087_v6  ;;  %v1897_v10 = vld.sshfl [vmem:[%s2574_s1 + $0x2] sm:$0x11 pattern:$0x75316420] (!%p263_p2) }
   0x7   : > { %2024 = vset.pattern.permute.xlu0 (!%p263_p2), %v2078_v0  ;;  %2025 = vset.pattern.permute.xlu1 (!%p263_p2), %v2078_v0  ;;  %s2081_s13 = smov (!%p263_p2), 17   ;;  %s2082_s14 = smov (!%p263_p2), 1   ;;  %v334_v9 = vshrl.u32 (!%p263_p2), %v313_v5, 7  ;;  %v380_v15 = vcombine.high (!%p263_p2), %v1897_v10, %v1897_v10  ;;  %v2196_v26 = vand.u32 (!%p263_p2), 127, %v313_v5  ;;  %vm417_vm3 = vcmask (!%p263_p2), 1043456  }
   0x8   : > { %s2083_s15 = smov (!%p263_p2), 127   ;;  %s2084_s16 = smov (!%p263_p2), 113   ;;  %v332_v8 = vunpack.c.0.s8 (!%p263_p2), %v331_v7  ;;  %v1895_v11 = vld.sshfl [vmem:[%s2574_s1] sm:$0x11 pattern:$0x75316420] (!%p263_p2) }
   0x9   : > { %s2085_s17 = smov (!%p263_p2), 112   ;;  %s2086_s18 = smov (!%p263_p2), 111   ;;  %v1904_v12 = vld.sshfl [vmem:[%s2574_s1 + $0x4] sm:$0x11 pattern:$0x75316420] (!%p263_p2)  ;;  %v329_v16 = vcombine.high (!%p263_p2), %v1895_v11, %v1895_v11 }
   0xa   : > { %v1909_v13 = vld.sshfl [vmem:[%s2574_s1 + $0x6] sm:$0x11 pattern:$0x75316420] (!%p263_p2)  ;;  %v2186_v14 = vsub.s32 (!%p263_p2), %v332_v8, %v334_v9  ;;  %v534_v18 = vcombine.high (!%p263_p2), %v1904_v12, %v1904_v12  ;;  %v2206_v33 = vsub.s32 (!%p263_p2), 0, %v334_v9  ;;  %vm519_vm0 = vcmp.lt.s32.totalorder (!%p263_p2), %v2196_v26, 15 }
   0xb   : > { %v1917_v17 = vld.sshfl [vmem:[%s2574_s1 + $0xa] sm:$0x11 pattern:$0x75316420] (!%p263_p2)  ;;  %v638_v19 = vcombine.high (!%p263_p2), %v1909_v13, %v1909_v13  ;;  %vm365_vm1 = vcmp.lt.s32.totalorder (!%p263_p2), %v2196_v26, 16  ;;  %vm623_vm2 = vcmp.lt.s32.totalorder (!%p263_p2), %v2196_v26, 1 }
   0xc   : > { %v798_v20 = vcombine.high (!%p263_p2), %v1917_v17, %v1917_v17  ;;  %v394_v21 = vrot.slane (!%p263_p2), %v380_v15, %v2186_v14  ;;  %v387_v22 = vrot.slane (!%p263_p2), %v1897_v10, %v2186_v14  ;;  %v343_v23 = vrot.slane (!%p263_p2), %v329_v16, %v2186_v14  ;;  %v1922_v30 = vld.sshfl [vmem:[%s2574_s1 + $0xc] sm:$0x11 pattern:$0x75316420] (!%p263_p2) }
   0xd   : > { %s2583_s28 = smov (!%p296_p3, %s1886_s28), 1  ;;  %v336_v24 = vrot.slane %v1895_v11, %v2186_v14  ;;  %v541_v25 = vrot.slane %v1904_v12, %v2186_v14  ;;  %v548_v27 = vrot.slane %v534_v18, %v2186_v14  ;;  %v652_v28 = vrot.slane %v638_v19, %v2186_v14  ;;  %v1927_v43 = vld.sshfl [vmem:[%s2574_s1 + $0xe] sm:$0x11 pattern:$0x75316420] }
   0xe   : > { %s1964_s29 = sshll.u32 %s2583_s28, 4  ;;  %v645_v29 = vrot.slane %v1909_v13, %v2186_v14  ;;  %v812_v31 = vrot.slane %v798_v20, %v2186_v14  ;;  %v805_v32 = vrot.slane %v1917_v17, %v2186_v14  ;;  %v403_v34 = vpack.i.b16 %v394_v21, %v394_v21  ;;  %v2250_v58 = vld.sshfl [vmem:[%s2574_s1 + $0x10] sm:$0x11 pattern:$0x75316420] }
   0xf   : > { %s2149_s10 = scalar_lea.vmem %s2573_s0, %s1964_s29  ;;  %v396_v35 = vpack.i.b16 %v387_v22, %v387_v22  ;;  %v352_v36 = vpack.i.b16 %v343_v23, %v343_v23  ;;  %v345_v37 = vpack.i.b16 %v336_v24, %v336_v24  ;;  %v550_v38 = vpack.i.b16 %v541_v25, %v541_v25 }
  0x10   : > { %v2154_v1 = vld [vmem:[%s2149_s10] sm:$0xff]  ;;  %v2157_v2 = vld [vmem:[%s2149_s10 + $0x8] sm:$0xff]  ;;  %v902_v39 = vcombine.high %v1922_v30, %v1922_v30  ;;  %v557_v40 = vpack.i.b16 %v548_v27, %v548_v27  ;;  %v661_v41 = vpack.i.b16 %v652_v28, %v652_v28  ;;  %v654_v42 = vpack.i.b16 %v645_v29, %v645_v29 }
  0x11   : > { %v1984_v3 = vpack.i.bf16 %v2157_v2, %v2154_v1  ;;  %v821_v44 = vpack.i.b16 %v812_v31, %v812_v31  ;;  %v814_v45 = vpack.i.b16 %v805_v32, %v805_v32  ;;  %v2215_v46 = vrot.slane %v1922_v30, %v2186_v14 }
  0x12   : > { %v2218_v47 = vrot.slane %v403_v34, %v2206_v33  ;;  %v2221_v48 = vrot.slane %v396_v35, %v2206_v33  ;;  %vm315_vm4 = vcmp.lt.s32.totalorder %v2196_v26, 17  ;;  %v2225_v49 = vrot.slane %v352_v36, %v2206_v33 }
  0x13   : > { %1985 = vrot.lane.b32.xlu0 %v1984_v3, %s2079_s11  ;;  %1995 = vrot.lane.b32.xlu1 %v1984_v3, %s2080_s12  ;;  %v2228_v50 = vrot.slane %v345_v37, %v2206_v33  ;;  %v2231_v51 = vrot.slane %v550_v38, %v2206_v33  ;;  %v2234_v52 = vrot.slane %v902_v39, %v2186_v14  ;;  %vm783_vm5 = vcmp.lt.s32.totalorder %v2196_v26, 127 }
  0x14   : > { %v1006_v53 = vcombine.high %v1927_v43, %v1927_v43  ;;  %v2237_v54 = vrot.slane %v557_v40, %v2206_v33  ;;  %v2240_v55 = vrot.slane %v661_v41, %v2206_v33  ;;  %v2243_v56 = vrot.slane %v654_v42, %v2206_v33 }
  0x15   : > { %v724_v57 = vpack.c.bf16 %v2157_v2, %v2157_v2  ;;  %v723_v61 = vpack.c.bf16 %v2154_v1, %v2154_v1  ;;  %v2256_v62 = vrot.slane %v821_v44, %v2206_v33  ;;  %v2259_v63 = vrot.slane %v814_v45, %v2206_v33  ;;  %v1905_v2 = vld [vmem:[%s2575_s2 + $0x8] sm:$0xf] }
  0x16   : > { %vm413_vm6 = vcmask 64512   ;;  %vm887_vm7 = vcmp.lt.s32.totalorder %v2196_v26, 113  ;;  %v925_v8 = vpack.i.b16 %v2234_v52, %v2234_v52  ;;  %v2267_v9 = vrot.slane %v1006_v53, %v2186_v14 }
  0x17   : > { %1990 = vrot.lane.b32.xlu0 %v1984_v3, %s2081_s13  ;;  %2000 = vrot.lane.b32.xlu1 %v1984_v3, %s2082_s14  ;;  %v2270_v10 = vrot.slane %v1927_v43, %v2186_v14  ;;  %v1110_v11 = vcombine.high %v2250_v58, %v2250_v58  ;;  %v1898_v43 = vld [vmem:[%s2575_s2 + $0x4] sm:$0xf]  ;;  %vm991_vm8 = vcmp.lt.s32.totalorder %v2196_v26, 112  ;;  %vm1095_vm9 = vcmp.lt.s32.totalorder %v2196_v26, 111  ;;  %v1950_v26 = vld [vmem:[%s2577_s4 + $0x14] sm:$0xf] }
  0x1b   : > { %2005 = vrot.lane.b32.xlu0 %v1984_v3, %s2083_s15  ;;  %2010 = vrot.lane.b32.xlu1 %v1984_v3, %s2084_s16 }
  0x1f   : > { %2015 = vrot.lane.b32.xlu0 %v1984_v3, %s2085_s17  ;;  %2020 = vrot.lane.b32.xlu1 %v1984_v3, %s2086_s18  ;;  %v918_v3 = vpack.i.b16 %v2215_v46, %v2215_v46 }
  0x23   : > { %1198 = vperm.xlu0 %2024, %v1195_v4  }
  0x85   : > { %v1986_v59 = vpop.permute.xlu0 %1985  ;;  %v1996_v60 = vpop.permute.xlu1 %1995 }
  0x86   : > { %v1988_v4 = vunpack.i.h.bf16 %v1986_v59  ;;  %v1987_v5 = vunpack.i.l.bf16 %v1986_v59  ;;  %v1998_v6 = vunpack.i.h.bf16 %v1996_v60  ;;  %v1997_v7 = vunpack.i.l.bf16 %v1996_v60 }
  0x88   : > { %v520_v12 = vsel %vm519_vm0, %v1997_v7, %v1998_v6  ;;  %v521_v13 = vsel %vm519_vm0, %v1998_v6, %v1997_v7  ;;  %v366_v15 = vsel %vm365_vm1, %v1987_v5, %v1988_v4  ;;  %v367_v16 = vsel %vm365_vm1, %v1988_v4, %v1987_v5 }
  0x89   : > { %v1991_v17 = vpop.permute.xlu0 %1990  ;;  %v522_v18 = vpack.c.bf16 %v521_v13, %v521_v13  ;;  %v523_v19 = vpack.c.bf16 %v520_v12, %v520_v12  ;;  %v369_v20 = vpack.c.bf16 %v366_v15, %v366_v15  ;;  %v368_v21 = vpack.c.bf16 %v367_v16, %v367_v16  ;;  %v2001_v22 = vpop.permute.xlu1 %2000 }
  0x8a   : > { %v1993_v23 = vunpack.i.h.bf16 %v1991_v17  ;;  %v1992_v24 = vunpack.i.l.bf16 %v1991_v17  ;;  %v2003_v25 = vunpack.i.h.bf16 %v2001_v22  ;;  %v2002_v27 = vunpack.i.l.bf16 %v2001_v22 }
  0x8b   : > { %v410_v28 = vmul.bf16 %v2218_v47, %v369_v20  ;;  %v409_v29 = vmul.bf16 %v2221_v48, %v368_v21  ;;  %v564_v30 = vmul.bf16 %v2237_v54, %v523_v19  ;;  %v563_v31 = vmul.bf16 %v2231_v51, %v522_v18 }
  0x8c   : > { %v624_v32 = vsel %vm623_vm2, %v2002_v27, %v2003_v25  ;;  %v625_v34 = vsel %vm623_vm2, %v2003_v25, %v2002_v27  ;;  %v316_v35 = vsel %vm315_vm4, %v1992_v24, %v1993_v23  ;;  %v317_v36 = vsel %vm315_vm4, %v1993_v23, %v1992_v24 }
  0x8d   : > { %1899 = vmatprep.subr.msk.bf16.mxu0 %vm417_vm3, %v410_v28  ;;  %v419_v37 = vsel %vm417_vm3, %v409_v29, 0  ;;  %v626_v38 = vpack.c.bf16 %v625_v34, %v625_v34  ;;  %v627_v39 = vpack.c.bf16 %v624_v32, %v624_v32  ;;  %v319_v40 = vpack.c.bf16 %v316_v35, %v316_v35  ;;  %v2006_v41 = vpop.permute.xlu0 %2005  ;;  %v2011_v42 = vpop.permute.xlu1 %2010 }
  0x8e   : > { %425 = vmatpush1.bf16.msra.mxu0 %v419_v37  ;;  %v318_v44 = vpack.c.bf16 %v317_v36, %v317_v36  ;;  %v571_v45 = vsel %vm417_vm3, %v563_v31, 0  ;;  %v2008_v52 = vunpack.i.h.bf16 %v2006_v41  ;;  %v2007_v53 = vunpack.i.l.bf16 %v2006_v41 }
  0x8f   : > { %v359_v59 = vmul.bf16 %v2225_v49, %v319_v40  ;;  %1906 = vmatprep.subr.msk.bf16.mxu0 %vm417_vm3, %v564_v30  ;;  %v668_v60 = vmul.bf16 %v2240_v55, %v627_v39  ;;  %v667_v4 = vmul.bf16 %v2243_v56, %v626_v38  ;;  %v2013_v5 = vunpack.i.h.bf16 %v2011_v42  ;;  %v1910_v38 = vld [vmem:[%s2575_s2 + $0xc] sm:$0xf] }
  0x90   : > { %v358_v6 = vmul.bf16 %v2228_v50, %v318_v44  ;;  %v784_v7 = vsel %vm783_vm5, %v2007_v53, %v2008_v52  ;;  %v785_v12 = vsel %vm783_vm5, %v2008_v52, %v2007_v53  ;;  %v2012_v13 = vunpack.i.l.bf16 %v2011_v42  ;;  %v1913_v53 = vld [vmem:[%s2575_s2 + $0x10] sm:$0xf] }
  0x91   : > { %1900 = vmatmul.mubr.msk.bf16.vlgmr.msra.gmra.mrb[0].mxu0 %vm413_vm6, %v1898_v43  ;;  %1901 = vmatprep.subr.msk.bf16.mxu1 %vm417_vm3, %v359_v59  ;;  %v787_v15 = vpack.c.bf16 %v785_v12, %v785_v12  ;;  %v2016_v16 = vpop.permute.xlu0 %2015  ;;  %v2021_v17 = vpop.permute.xlu1 %2020  ;;  %v2313_v18 = vrot.slane %v925_v8, %v2206_v33  ;;  %v1029_v19 = vpack.i.b16 %v2267_v9, %v2267_v9  ;;  %v360_v8 = vld [vmem:[%s2575_s2] sm:$0xf]  ;;  %v675_v25 = vsel %vm417_vm3, %v667_v4, 0 }
  0x92   : > { %v469_v20 = vsel %vm417_vm3, %v358_v6, 0  ;;  %577 = vmatpush1.bf16.msra.mxu0 %v571_v45  ;;  %608 = vmatprep.mubr.bf16.mxu0 %v2078_v0  ;;  %v889_v21 = vsel %vm887_vm7, %v2013_v5, %v2012_v13  ;;  %v2018_v22 = vunpack.i.h.bf16 %v2016_v16  ;;  %v1124_v23 = vrot.slane %v1110_v11, %v2186_v14 }
  0x93   : > { %475 = vmatpush1.bf16.msra.mxu1 %v469_v20  ;;  %v786_v24 = vpack.c.bf16 %v784_v7, %v784_v7  ;;  %v891_v9 = vpack.c.bf16 %v889_v21, %v889_v21  ;;  %1914 = vmatprep.subr.msk.bf16.mxu0 %vm417_vm3, %v724_v57  ;;  %v2017_v27 = vunpack.i.l.bf16 %v2016_v16  ;;  %v888_v11 = vsel %vm887_vm7, %v2012_v13, %v2013_v5  ;;  %v1918_v7 = vld [vmem:[%s2575_s2 + $0x14] sm:$0xf]  ;;  %v1923_v13 = vld [vmem:[%s2575_s2 + $0x18] sm:$0xf]  ;;  %v1928_v16 = vld [vmem:[%s2575_s2 + $0x1c] sm:$0xf] }
  0x94   : > { %1911 = vmatprep.subr.msk.bf16.mxu1 %vm417_vm3, %v668_v60  ;;  %v828_v28 = vmul.bf16 %v2256_v62, %v787_v15  ;;  %v2023_v29 = vunpack.i.h.bf16 %v2021_v17  ;;  %v2022_v30 = vunpack.i.l.bf16 %v2021_v17  ;;  %v2345_v57 = vrot.slane %v918_v3, %v2206_v33  ;;  %v1933_v17 = vld [vmem:[%s2575_s2 + $0x20] sm:$0xf] }
  0x95   : > { %v993_v31 = vsel %vm991_vm8, %v2018_v22, %v2017_v27  ;;  %v1022_v32 = vpack.i.b16 %v2270_v10, %v2270_v10  ;;  %v1117_v34 = vrot.slane %v2250_v58, %v2186_v14  ;;  %v890_v35 = vpack.c.bf16 %v888_v11, %v888_v11 }
  0x96   : > { %1902 = vmatmul.mubr.msk.bf16.vlgmr.msra.gmra.mrb[0].mxu1 %vm413_vm6, %v360_v8  ;;  %v731_v36 = vsel %vm417_vm3, %v723_v61, 0  ;;  %v932_v37 = vmul.bf16 %v2313_v18, %v891_v9  ;;  %v1133_v46 = vpack.i.b16 %v1124_v23, %v1124_v23  ;;  %v995_v3 = vpack.c.bf16 %v993_v31, %v993_v31 }
  0x97   : > { %681 = vmatpush1.bf16.msra.mxu1 %v675_v25  ;;  %712 = vmatprep.mubr.bf16.mxu1 %v2078_v0  ;;  %v827_v10 = vmul.bf16 %v2259_v63, %v786_v24  ;;  %v1097_v14 = vsel %vm1095_vm9, %v2023_v29, %v2022_v30  ;;  %v2362_v58 = vrot.slane %v1029_v19, %v2206_v33 }
  0x98   : > { %1919 = vmatprep.subr.msk.bf16.mxu1 %vm417_vm3, %v828_v28  ;;  %v992_v1 = vsel %vm991_vm8, %v2017_v27, %v2018_v22  ;;  %v2369_v61 = vrot.slane %v1022_v32, %v2206_v33  ;;  %v1099_v39 = vpack.c.bf16 %v1097_v14, %v1097_v14  ;;  %v931_v40 = vmul.bf16 %v2345_v57, %v890_v35 }
  0x99   : > { %1907 = vmatmul.mubr.msk.bf16.vlgmr.msra.gmra.mrb[4].mxu0 %vm413_vm6, %v1905_v2  ;;  %v2377_v41 = vrot.slane %v1133_v46, %v2206_v33  ;;  %v1126_v42 = vpack.i.b16 %v1117_v34, %v1117_v34  ;;  %v994_v43 = vpack.c.bf16 %v992_v1, %v992_v1  ;;  %v835_v44 = vsel %vm417_vm3, %v827_v10, 0 }
  0x9a   : > { %737 = vmatpush1.bf16.msra.mxu0 %v731_v36  ;;  %768 = vmatprep.mubr.bf16.mxu0 %v2078_v0  ;;  %v1096_v45 = vsel %vm1095_vm9, %v2022_v30, %v2023_v29  ;;  %v1036_v52 = vmul.bf16 %v2362_v58, %v995_v3  ;;  %v939_v60 = vsel %vm417_vm3, %v931_v40, 0 }
  0x9b   : > { %1924 = vmatprep.subr.msk.bf16.mxu0 %vm417_vm3, %v932_v37  ;;  %v1098_v59 = vpack.c.bf16 %v1096_v45, %v1096_v45  ;;  %v1140_v4 = vmul.bf16 %v2377_v41, %v1099_v39  ;;  %v2391_v5 = vrot.slane %v1126_v42, %v2206_v33  ;;  %v1035_v6 = vmul.bf16 %v2369_v61, %v994_v43 }
  0x9d   : > { %v1139_v12 = vmul.bf16 %v2391_v5, %v1098_v59  ;;  %v1043_v33 = vsel %vm417_vm3, %v1035_v6, 0 }
  0x9e   : > { %1912 = vmatmul.mubr.msk.bf16.vlgmr.msra.gmra.mrb[4].mxu1 %vm413_vm6, %v1910_v38 }
  0x9f   : > { %841 = vmatpush1.bf16.msra.mxu1 %v835_v44  ;;  %872 = vmatprep.mubr.bf16.mxu1 %v2078_v0  ;;  %v1147_v15 = vsel %vm417_vm3, %v1139_v12, 0 }
  0xa0   : > { %1929 = vmatprep.subr.msk.bf16.mxu1 %vm417_vm3, %v1036_v52 }
  0xa1   : > { %1915 = vmatmul.mubr.msk.bf16.vlgmr.msra.gmra.mrb[8].mxu0 %vm413_vm6, %v1913_v53 }
  0xa2   : > { %945 = vmatpush1.bf16.msra.mxu0 %v939_v60  ;;  %976 = vmatprep.mubr.bf16.mxu0 %v2078_v0 }
  0xa3   : > { %1934 = vmatprep.subr.msk.bf16.mxu0 %vm417_vm3, %v1140_v4 }
  0xa6   : > { %1920 = vmatmul.mubr.msk.bf16.vlgmr.msra.gmra.mrb[8].mxu1 %vm413_vm6, %v1918_v7 }
  0xa7   : > { %1049 = vmatpush1.bf16.msra.mxu1 %v1043_v33  ;;  %1080 = vmatprep.mubr.bf16.mxu1 %v2078_v0 }
  0xa9   : > { %1925 = vmatmul.mubr.msk.bf16.vlgmr.msra.gmra.mrb[12].mxu0 %vm413_vm6, %v1923_v13 }
  0xaa   : > { %1153 = vmatpush1.bf16.msra.mxu0 %v1147_v15  ;;  %1184 = vmatprep.mubr.bf16.mxu0 %v2078_v0 }
  0xae   : > { %1930 = vmatmul.mubr.msk.bf16.vlgmr.msra.gmra.mrb[12].mxu1 %vm413_vm6, %v1928_v16 }
  0xaf   : > { %1314 = vmatprep.mubr.bf16.mxu1 %v2078_v0 }
  0xb1   : > { %1935 = vmatmul.mubr.msk.bf16.vlgmr.msra.gmra.mrb[16].mxu0 %vm413_vm6, %v1933_v17  ;;  %v1199_v17 = vpop.permute.xlu0 %1198 }
  0xb2   : > { %1364 = vmatprep.mubr.bf16.mxu0 %v2078_v0 }
 0x164   : > { %v458_v19 = vpop.f32.mrb[0].mxu0 }
 0x165   : > { %v460_v20 = vpop.f32.mrb[1].mxu0 }
 0x166   : > { %v462_v21 = vpop.f32.mrb[2].mxu0 }
 0x167   : > { %v463_v22 = vpop.f32.mrb[3].mxu0 }
 0x169   : > { %v508_v23 = vpop.f32.mrb[0].mxu1 }
 0x16a   : > { %v509_v8 = vadd.f32 %v508_v23, %v458_v19  ;;  %v510_v24 = vpop.f32.mrb[1].mxu1 }
 0x16b   : > { %v511_v25 = vadd.f32 %v510_v24, %v460_v20  ;;  %v512_v9 = vpop.f32.mrb[2].mxu1 }
 0x16c   : > { %v513_v27 = vpop.f32.mrb[3].mxu1  ;;  %v610_v11 = vpop.f32.mrb[4].mxu0 }
 0x16d   : > { %v617_v28 = vadd.f32 %v610_v11, %v509_v8  ;;  %v612_v29 = vpop.f32.mrb[5].mxu0 }
 0x16e   : > { %v618_v30 = vadd.f32 %v612_v29, %v511_v25  ;;  %v614_v31 = vpop.f32.mrb[6].mxu0 }
 0x16f   : > { %v615_v2 = vpop.f32.mrb[7].mxu0 }
 0x171   : > { %v714_v32 = vpop.f32.mrb[4].mxu1 }
 0x172   : > { %v721_v34 = vadd.f32 %v714_v32, %v617_v28  ;;  %v716_v35 = vpop.f32.mrb[5].mxu1 }
 0x173   : > { %v722_v36 = vadd.f32 %v716_v35, %v618_v30  ;;  %v718_v37 = vpop.f32.mrb[6].mxu1 }
 0x174   : > { %v719_v46 = vpop.f32.mrb[7].mxu1  ;;  %v770_v3 = vpop.f32.mrb[8].mxu0 }
 0x175   : > { %v777_v10 = vadd.f32 %v770_v3, %v721_v34  ;;  %v772_v14 = vpop.f32.mrb[9].mxu0  ;;  %v1232_v46 = vld [vmem:[%s2579_s6] sm:$0xf] }
 0x176   : > { %v778_v1 = vadd.f32 %v772_v14, %v722_v36  ;;  %v774_v38 = vpop.f32.mrb[10].mxu0  ;;  %v1240_v3 = vld [vmem:[%s2580_s7] sm:$0xf] }
 0x177   : > { %v775_v39 = vpop.f32.mrb[11].mxu0 }
 0x179   : > { %v874_v40 = vpop.f32.mrb[8].mxu1 }
 0x17a   : > { %v881_v42 = vadd.f32 %v874_v40, %v777_v10  ;;  %v876_v43 = vpop.f32.mrb[9].mxu1 }
 0x17b   : > { %v882_v44 = vadd.f32 %v876_v43, %v778_v1  ;;  %v878_v45 = vpop.f32.mrb[10].mxu1 }
 0x17c   : > { %v879_v52 = vpop.f32.mrb[11].mxu1  ;;  %v978_v53 = vpop.f32.mrb[12].mxu0 }
 0x17d   : > { %v985_v59 = vadd.f32 %v978_v53, %v881_v42  ;;  %v980_v60 = vpop.f32.mrb[13].mxu0 }
 0x17e   : > { %v986_v4 = vadd.f32 %v980_v60, %v882_v44  ;;  %v982_v6 = vpop.f32.mrb[14].mxu0 }
 0x17f   : > { %v983_v7 = vpop.f32.mrb[15].mxu0 }
 0x181   : > { %v1082_v12 = vpop.f32.mrb[12].mxu1 }
 0x182   : > { %v1089_v33 = vadd.f32 %v1082_v12, %v985_v59  ;;  %v1084_v13 = vpop.f32.mrb[13].mxu1 }
 0x183   : > { %v1090_v15 = vadd.f32 %v1084_v13, %v986_v4  ;;  %v1086_v16 = vpop.f32.mrb[14].mxu1 }
 0x184   : > { %v1087_v19 = vpop.f32.mrb[15].mxu1  ;;  %v1186_v20 = vpop.f32.mrb[16].mxu0  ;;  %v1813_v16 = vld [vmem:[%s2578_s5] sm:$0xff] }
 0x185   : > { %v1193_v21 = vadd.f32 %v1186_v20, %v1089_v33  ;;  %v1188_v22 = vpop.f32.mrb[17].mxu0 }
 0x186   : > { %v1194_v23 = vadd.f32 %v1188_v22, %v1090_v15  ;;  %v1190_v8 = vpop.f32.mrb[18].mxu0 }
 0x187   : > { %v1201_v24 = vadd.f32 %v1199_v17, %v1193_v21  ;;  %v1191_v25 = vpop.f32.mrb[19].mxu0 }
 0x188   : > { %v1202_v9 = vadd.f32 %v1199_v17, %v1194_v23 }
 0x189   : > { %vm1203_vm10 = vcmp.ge.f32.partialorder %v1201_v24, 0.0  ;;  %v1205_v27 = vmul.f32 0.2, %v1201_v24 }
 0x18a   : > { %vm1204_vm11 = vcmp.ge.f32.partialorder %v1202_v9, 0.0  ;;  %v1206_v11 = vmul.f32 0.2, %v1202_v9 }
 0x18b   : > { %v1207_v28 = vsel %vm1203_vm10, %v1201_v24, %v1205_v27 }
 0x18c   : > { %v1208_v29 = vsel %vm1204_vm11, %v1202_v9, %v1206_v11  ;;  %v1209_v30 = vsel %vm417_vm3, %v1207_v28, 0.0  ;;  %v1216_v31 = vmul.f32 %v1207_v28, %v1207_v28 }
 0x18d   : > { %v1210_v2 = vsel %vm417_vm3, %v1208_v29, 0.0  ;;  %v1217_v32 = vmul.f32 %v1208_v29, %v1208_v29 }
 0x18e   : > { %v1211_v34 = vadd.f32 %v1210_v2, %v1209_v30  ;;  %v1218_v35 = vsel %vm417_vm3, %v1216_v31, 0.0 }
 0x18f   : > { %v1219_v36 = vsel %vm417_vm3, %v1217_v32, 0.0 }
 0x190   : > { %1212 = vadd.xlane.f32.xlu1 %v1211_v34  ;;  %v1220_v37 = vadd.f32 %v1219_v36, %v1218_v35 }
 0x192   : > { %1221 = vadd.xlane.f32.xlu0 %v1220_v37 }
 0x1a1   : > { %1235 = vperm.xlu1 %2025, %v1232_v46  }
 0x1a8   : > { %1243 = vperm.xlu0 %2024, %v1240_v3  }
 0x21d   : > { %v1213_v10 = vpop.xlane.xlu1 %1212 }
 0x21e   : > { %v1215_v14 = vmul.f32 0.00390625, %v1213_v10 }
 0x21f   : > { %v1222_v1 = vpop.xlane.xlu0 %1221 }
 0x220   : > { %v1223_v38 = vmul.f32 0.00390625, %v1222_v1  ;;  %v1224_v39 = vmul.f32 %v1215_v14, %v1215_v14  ;;  %v1226_v43 = vsub.f32 %v1207_v28, %v1215_v14  ;;  %v1227_v44 = vsub.f32 %v1208_v29, %v1215_v14 }
 0x221   : > { %v1236_v52 = vpop.permute.xlu1 %1235 }
 0x222   : > { %v1225_v40 = vsub.f32 %v1223_v38, %v1224_v39 }
 0x224   : > { %v1228_v42 = vadd.f32 1e-05, %v1225_v40 }
 0x226   : > { %2066 = vrsqrt.f32 %v1228_v42 }
 0x227   : > { %v1244_v6 = vpop.permute.xlu0 %1243 }
 0x230   : > { %v2067_v45 = vpop.eup %2066 }
 0x231   : > { %v1230_v53 = vmul.f32 %v2067_v45, %v1226_v43  ;;  %v1231_v59 = vmul.f32 %v2067_v45, %v1227_v44 }
 0x233   : > { %v1238_v60 = vmul.f32 %v1236_v52, %v1230_v53  ;;  %v1239_v4 = vmul.f32 %v1236_v52, %v1231_v59 }
 0x235   : > { %v1246_v7 = vadd.f32 %v1244_v6, %v1238_v60  ;;  %v1247_v12 = vadd.f32 %v1244_v6, %v1239_v4 }
 0x237   : > { %v2432_v33 = vsel %vm417_vm3, %v1246_v7, %v1207_v28  ;;  %v2435_v13 = vsel %vm417_vm3, %v1247_v12, %v1208_v29 }
 0x238   : > { %v2036_v15 = vpack.i.bf16 %v2435_v13, %v2432_v33  ;;  %v1502_v59 = vpack.c.bf16 %v2435_v13, %v2435_v13 }
 0x23a   : > { %2037 = vrot.lane.b32.xlu0 %v2036_v15, %s2080_s12  ;;  %2027 = vrot.lane.b32.xlu1 %v2036_v15, %s2079_s11 }
 0x23e   : > { %2047 = vrot.lane.b32.xlu0 %v2036_v15, %s2083_s15  ;;  %2032 = vrot.lane.b32.xlu1 %v2036_v15, %s2081_s13  ;;  %s305_s13 = scalar_lea.vmem %s2581_s8, %s1964_s29 }
 0x242   : > { %2057 = vrot.lane.b32.xlu0 %v2036_v15, %s2085_s17  ;;  %2042 = vrot.lane.b32.xlu1 %v2036_v15, %s2082_s14 }
 0x246   : > { %1816 = vperm.xlu0 %2024, %v1813_v16   ;;  %2052 = vrot.lane.b32.xlu1 %v2036_v15, %s2084_s16 }
 0x24a   : > { %2062 = vrot.lane.b32.xlu1 %v2036_v15, %s2086_s18 }
 0x2ac   : > { %v2038_v17 = vpop.permute.xlu0 %2037  ;;  %v2028_v19 = vpop.permute.xlu1 %2027 }
 0x2ad   : > { %v2040_v20 = vunpack.i.h.bf16 %v2038_v17  ;;  %v2039_v21 = vunpack.i.l.bf16 %v2038_v17  ;;  %v2030_v22 = vunpack.i.h.bf16 %v2028_v19  ;;  %v2029_v23 = vunpack.i.l.bf16 %v2028_v19  ;;  %v1260_v17 = vld [vmem:[%s2577_s4] sm:$0xf] }
 0x2af   : > { %v1377_v8 = vsel %vm519_vm0, %v2039_v21, %v2040_v20  ;;  %v1378_v24 = vsel %vm519_vm0, %v2040_v20, %v2039_v21  ;;  %v1265_v25 = vsel %vm365_vm1, %v2029_v23, %v2030_v22  ;;  %v1266_v9 = vsel %vm365_vm1, %v2030_v22, %v2029_v23 }
 0x2b0   : > { %v1380_v27 = vpack.c.bf16 %v1377_v8, %v1377_v8  ;;  %v1267_v11 = vpack.c.bf16 %v1266_v9, %v1266_v9  ;;  %v1268_v28 = vpack.c.bf16 %v1265_v25, %v1265_v25  ;;  %v2048_v29 = vpop.permute.xlu0 %2047  ;;  %v2033_v30 = vpop.permute.xlu1 %2032  ;;  %v1379_v35 = vpack.c.bf16 %v1378_v24, %v1378_v24 }
 0x2b1   : > { %v2050_v31 = vunpack.i.h.bf16 %v2048_v29  ;;  %v2049_v2 = vunpack.i.l.bf16 %v2048_v29  ;;  %v2035_v32 = vunpack.i.h.bf16 %v2033_v30  ;;  %v2034_v34 = vunpack.i.l.bf16 %v2033_v30 }
 0x2b2   : > { %v1270_v36 = vmul.bf16 %v1268_v28, %v2218_v47  ;;  %v1269_v37 = vmul.bf16 %v1267_v11, %v2221_v48  ;;  %v1382_v47 = vmul.bf16 %v1380_v27, %v2237_v54  ;;  %v1381_v45 = vmul.bf16 %v1379_v35, %v2231_v51  ;;  %v1936_v54 = vld [vmem:[%s2577_s4 + $0x4] sm:$0xf] }
 0x2b3   : > { %v1254_v46 = vsel %vm315_vm4, %v2034_v34, %v2035_v32  ;;  %v1255_v3 = vsel %vm315_vm4, %v2035_v32, %v2034_v34  ;;  %v1562_v38 = vsel %vm783_vm5, %v2050_v31, %v2049_v2  ;;  %v1501_v25 = vpack.c.bf16 %v2432_v33, %v2432_v33  ;;  %v1944_v32 = vld [vmem:[%s2577_s4 + $0xc] sm:$0xf] }
 0x2b4   : > { %v1256_v10 = vpack.c.bf16 %v1255_v3, %v1255_v3  ;;  %v1257_v14 = vpack.c.bf16 %v1254_v46, %v1254_v46  ;;  %v2043_v1 = vpop.permute.xlu1 %2042  ;;  %1937 = vmatprep.subr.msk.bf16.mxu1 %vm417_vm3, %v1270_v36  ;;  %v2058_v42 = vpop.permute.xlu0 %2057  ;;  %v1277_v48 = vsel %vm417_vm3, %v1269_v37, 0  ;;  %v1389_v13 = vsel %vm417_vm3, %v1381_v45, 0  ;;  %v1947_v3 = vld [vmem:[%s2577_s4 + $0x10] sm:$0xf] }
 0x2b5   : > { %v2045_v39 = vunpack.i.h.bf16 %v2043_v1  ;;  %v2044_v40 = vunpack.i.l.bf16 %v2043_v1  ;;  %1283 = vmatpush1.bf16.msra.mxu1 %v1277_v48  ;;  %v2060_v6 = vunpack.i.h.bf16 %v2058_v42  ;;  %v2059_v16 = vunpack.i.l.bf16 %v2058_v42  ;;  %v1953_v1 = vld [vmem:[%s2577_s4 + $0x18] sm:$0xf] }
 0x2b6   : > { %v1259_v43 = vmul.bf16 %v1257_v14, %v2225_v49  ;;  %v1258_v44 = vmul.bf16 %v1256_v10, %v2228_v50  ;;  %v1561_v49 = vsel %vm783_vm5, %v2049_v2, %v2050_v31  ;;  %v1564_v50 = vpack.c.bf16 %v1562_v38, %v1562_v38  ;;  %1942 = vmatprep.subr.msk.bf16.mxu1 %vm417_vm3, %v1382_v47 }
 0x2b7   : > { %v1441_v52 = vsel %vm623_vm2, %v2044_v40, %v2045_v39  ;;  %v1442_v53 = vsel %vm623_vm2, %v2045_v39, %v2044_v40  ;;  %v1563_v24 = vpack.c.bf16 %v1561_v49, %v1561_v49  ;;  %v1689_v33 = vsel %vm991_vm8, %v2059_v16, %v2060_v6  ;;  %v1956_v39 = vld [vmem:[%s2577_s4 + $0x1c] sm:$0xf] }
 0x2b8   : > { %v1443_v60 = vpack.c.bf16 %v1442_v53, %v1442_v53  ;;  %v1444_v51 = vpack.c.bf16 %v1441_v52, %v1441_v52  ;;  %v2053_v4 = vpop.permute.xlu1 %2052  ;;  %1939 = vmatprep.subr.msk.bf16.mxu0 %vm417_vm3, %v1259_v43  ;;  %v1327_v15 = vsel %vm417_vm3, %v1258_v44, 0  ;;  %1938 = vmatmul.mubr.msk.bf16.vlgmr.msra.gmra.mrb[16].mxu1 %vm413_vm6, %v1936_v54  ;;  %v1509_v2 = vsel %vm417_vm3, %v1501_v25, 0 }
 0x2b9   : > { %v2055_v7 = vunpack.i.h.bf16 %v2053_v4  ;;  %v2054_v12 = vunpack.i.l.bf16 %v2053_v4  ;;  %1333 = vmatpush1.bf16.msra.mxu0 %v1327_v15  ;;  %1395 = vmatpush1.bf16.msra.mxu1 %v1389_v13  ;;  %v1565_v30 = vmul.bf16 %v1563_v24, %v2259_v63  ;;  %v1691_v63 = vpack.c.bf16 %v1689_v33, %v1689_v33 }
 0x2ba   : > { %v1446_v19 = vmul.bf16 %v1444_v51, %v2240_v55  ;;  %v1445_v20 = vmul.bf16 %v1443_v60, %v2243_v56  ;;  %1426 = vmatprep.mubr.bf16.mxu1 %v2078_v0  ;;  %1948 = vmatprep.subr.msk.bf16.mxu1 %vm417_vm3, %v1502_v59  ;;  %v1566_v55 = vmul.bf16 %v1564_v50, %v2256_v62  ;;  %v1941_v62 = vld [vmem:[%s2577_s4 + $0x8] sm:$0xf] }
 0x2bb   : > { %v1626_v21 = vsel %vm887_vm7, %v2055_v7, %v2054_v12  ;;  %v1690_v56 = vsel %vm991_vm8, %v2060_v6, %v2059_v16  ;;  %v1625_v9 = vsel %vm887_vm7, %v2054_v12, %v2055_v7  ;;  %v1693_v10 = vmul.bf16 %v1691_v63, %v2369_v61 }
 0x2bc   : > { %v1628_v22 = vpack.c.bf16 %v1626_v21, %v1626_v21  ;;  %v2063_v23 = vpop.permute.xlu1 %2062  ;;  %1945 = vmatprep.subr.msk.bf16.mxu0 %vm417_vm3, %v1446_v19  ;;  %v1453_v8 = vsel %vm417_vm3, %v1445_v20, 0  ;;  %1940 = vmatmul.mubr.msk.bf16.vlgmr.msra.gmra.mrb[20].mxu0 %vm413_vm6, %v1260_v17  ;;  %v1692_v29 = vpack.c.bf16 %v1690_v56, %v1690_v56  ;;  %v1627_v31 = vpack.c.bf16 %v1625_v9, %v1625_v9 }
 0x2bd   : > { %1459 = vmatpush1.bf16.msra.mxu0 %v1453_v8  ;;  %1490 = vmatprep.mubr.bf16.mxu0 %v2078_v0  ;;  %v2065_v27 = vunpack.i.h.bf16 %v2063_v23  ;;  %v2064_v11 = vunpack.i.l.bf16 %v2063_v23  ;;  %v1701_v61 = vsel %vm417_vm3, %v1693_v10, 0 }
 0x2be   : > { %1951 = vmatprep.subr.msk.bf16.mxu0 %vm417_vm3, %v1566_v55  ;;  %v1630_v28 = vmul.bf16 %v1628_v22, %v2313_v18  ;;  %v1573_v18 = vsel %vm417_vm3, %v1565_v30, 0  ;;  %v1694_v35 = vmul.bf16 %v1692_v29, %v2362_v58  ;;  %v1629_v37 = vmul.bf16 %v1627_v31, %v2345_v57 }
 0x2bf   : > { %v1754_v34 = vsel %vm1095_vm9, %v2065_v27, %v2064_v11  ;;  %v1753_v46 = vsel %vm1095_vm9, %v2064_v11, %v2065_v27 }
 0x2c0   : > { %1943 = vmatmul.mubr.msk.bf16.vlgmr.msra.gmra.mrb[20].mxu1 %vm413_vm6, %v1941_v62  ;;  %v1756_v36 = vpack.c.bf16 %v1754_v34, %v1754_v34  ;;  %v1755_v14 = vpack.c.bf16 %v1753_v46, %v1753_v46  ;;  %v1637_v57 = vsel %vm417_vm3, %v1629_v37, 0 }
 0x2c1   : > { %1515 = vmatpush1.bf16.msra.mxu1 %v1509_v2  ;;  %1546 = vmatprep.mubr.bf16.mxu1 %v2078_v0 }
 0x2c2   : > { %1954 = vmatprep.subr.msk.bf16.mxu1 %vm417_vm3, %v1630_v28  ;;  %v1758_v58 = vmul.bf16 %v1756_v36, %v2377_v41  ;;  %v1757_v41 = vmul.bf16 %v1755_v14, %v2391_v5  ;;  %v1959_v5 = vld [vmem:[%s2577_s4 + $0x20] sm:$0xf] }
 0x2c4   : > { %1946 = vmatmul.mubr.msk.bf16.vlgmr.msra.gmra.mrb[24].mxu0 %vm413_vm6, %v1944_v32  ;;  %v1765_v38 = vsel %vm417_vm3, %v1757_v41, 0 }
 0x2c5   : > { %1579 = vmatpush1.bf16.msra.mxu0 %v1573_v18  ;;  %1610 = vmatprep.mubr.bf16.mxu0 %v2078_v0  ;;  %v1817_v36 = vpop.permute.xlu0 %1816 }
 0x2c6   : > { %1957 = vmatprep.subr.msk.bf16.mxu0 %vm417_vm3, %v1694_v35 }
 0x2c8   : > { %1949 = vmatmul.mubr.msk.bf16.vlgmr.msra.gmra.mrb[24].mxu1 %vm413_vm6, %v1947_v3 }
 0x2c9   : > { %1643 = vmatpush1.bf16.msra.mxu1 %v1637_v57  ;;  %1674 = vmatprep.mubr.bf16.mxu1 %v2078_v0 }
 0x2ca   : > { %1960 = vmatprep.subr.msk.bf16.mxu1 %vm417_vm3, %v1758_v58 }
 0x2cc   : > { %1952 = vmatmul.mubr.msk.bf16.vlgmr.msra.gmra.mrb[28].mxu0 %vm413_vm6, %v1950_v26 }
 0x2cd   : > { %1707 = vmatpush1.bf16.msra.mxu0 %v1701_v61  ;;  %1738 = vmatprep.mubr.bf16.mxu0 %v2078_v0  ;;  %v2068_v61 = vld [vmem:[%s2149_s10] sm:$0xff] }
 0x2d0   : > { %1955 = vmatmul.mubr.msk.bf16.vlgmr.msra.gmra.mrb[28].mxu1 %vm413_vm6, %v1953_v1 }
 0x2d1   : > { %1771 = vmatpush1.bf16.msra.mxu1 %v1765_v38  ;;  %1802 = vmatprep.mubr.bf16.mxu1 %v2078_v0  ;;  %v2069_v38 = vld [vmem:[%s2149_s10 + $0x8] sm:$0xff] }
 0x2d4   : > { %1958 = vmatmul.mubr.msk.bf16.vlgmr.msra.gmra.mrb[32].mxu0 %vm413_vm6, %v1956_v39 }
 0x2d8   : > { %1961 = vmatmul.mubr.msk.bf16.vlgmr.msra.gmra.mrb[32].mxu1 %vm413_vm6, %v1959_v5 }
 0x38b   : > { %v1316_v40 = vpop.f32.mrb[16].mxu1 }
 0x38c   : > { %v1318_v47 = vpop.f32.mrb[17].mxu1 }
 0x38d   : > { %v1320_v42 = vpop.f32.mrb[18].mxu1 }
 0x38e   : > { %v1321_v43 = vpop.f32.mrb[19].mxu1 }
 0x38f   : > { %v1366_v48 = vpop.f32.mrb[20].mxu0 }
 0x390   : > { %v1367_v44 = vadd.f32 %v1366_v48, %v1316_v40  ;;  %v1368_v45 = vpop.f32.mrb[21].mxu0 }
 0x391   : > { %v1369_v52 = vadd.f32 %v1368_v45, %v1318_v47  ;;  %v1370_v53 = vpop.f32.mrb[22].mxu0 }
 0x392   : > { %v1371_v54 = vpop.f32.mrb[23].mxu0 }
 0x393   : > { %v1428_v59 = vpop.f32.mrb[20].mxu1 }
 0x394   : > { %v1435_v0 = vadd.f32 %v1428_v59, %v1367_v44  ;;  %v1430_v49 = vpop.f32.mrb[21].mxu1 }
 0x395   : > { %v1436_v50 = vadd.f32 %v1430_v49, %v1369_v52  ;;  %v1432_v60 = vpop.f32.mrb[22].mxu1 }
 0x396   : > { %v1433_v4 = vpop.f32.mrb[23].mxu1 }
 0x397   : > { %v1492_v51 = vpop.f32.mrb[24].mxu0 }
 0x398   : > { %v1499_v6 = vadd.f32 %v1492_v51, %v1435_v0  ;;  %v1494_v7 = vpop.f32.mrb[25].mxu0 }
 0x399   : > { %v1500_v12 = vadd.f32 %v1494_v7, %v1436_v50  ;;  %v1496_v15 = vpop.f32.mrb[26].mxu0 }
 0x39a   : > { %v1497_v16 = vpop.f32.mrb[27].mxu0 }
 0x39b   : > { %v1548_v13 = vpop.f32.mrb[24].mxu1 }
 0x39c   : > { %v1555_v17 = vadd.f32 %v1548_v13, %v1499_v6  ;;  %v1550_v19 = vpop.f32.mrb[25].mxu1 }
 0x39d   : > { %v1556_v20 = vadd.f32 %v1550_v19, %v1500_v12  ;;  %v1552_v21 = vpop.f32.mrb[26].mxu1 }
 0x39e   : > { %v1553_v23 = vpop.f32.mrb[27].mxu1 }
 0x39f   : > { %v1612_v22 = vpop.f32.mrb[28].mxu0 }
 0x3a0   : > { %v1619_v8 = vadd.f32 %v1612_v22, %v1555_v17  ;;  %v1614_v24 = vpop.f32.mrb[29].mxu0 }
 0x3a1   : > { %v1620_v55 = vadd.f32 %v1614_v24, %v1556_v20  ;;  %v1616_v56 = vpop.f32.mrb[30].mxu0 }
 0x3a2   : > { %v1617_v25 = vpop.f32.mrb[31].mxu0 }
 0x3a3   : > { %v1676_v9 = vpop.f32.mrb[28].mxu1 }
 0x3a4   : > { %v1683_v27 = vadd.f32 %v1676_v9, %v1619_v8  ;;  %v1678_v11 = vpop.f32.mrb[29].mxu1 }
 0x3a5   : > { %v1684_v62 = vadd.f32 %v1678_v11, %v1620_v55  ;;  %v1680_v28 = vpop.f32.mrb[30].mxu1 }
 0x3a6   : > { %v1681_v30 = vpop.f32.mrb[31].mxu1 }
 0x3a7   : > { %v1740_v29 = vpop.f32.mrb[32].mxu0 }
 0x3a8   : > { %v1747_v33 = vadd.f32 %v1740_v29, %v1683_v27  ;;  %v1742_v31 = vpop.f32.mrb[33].mxu0 }
 0x3a9   : > { %v1748_v2 = vadd.f32 %v1742_v31, %v1684_v62  ;;  %v1744_v32 = vpop.f32.mrb[34].mxu0 }
 0x3aa   : > { %v1745_v34 = vpop.f32.mrb[35].mxu0 }
 0x3ab   : > { %v1804_v63 = vpop.f32.mrb[32].mxu1 }
 0x3ac   : > { %v1811_v18 = vadd.f32 %v1804_v63, %v1747_v33  ;;  %v1806_v35 = vpop.f32.mrb[33].mxu1 }
 0x3ad   : > { %v1812_v37 = vadd.f32 %v1806_v35, %v1748_v2  ;;  %v1808_v46 = vpop.f32.mrb[34].mxu1 }
 0x3ae   : > { %v1819_v3 = vadd.f32 %v1817_v36, %v1811_v18  ;;  %v1809_v10 = vpop.f32.mrb[35].mxu1 }
 0x3af   : > { %v1820_v14 = vadd.f32 %v1817_v36, %v1812_v37 }
 0x3b0   : > { %vm1821_vm12 = vcmp.ge.f32.partialorder %v1819_v3, 0.0  ;;  %v1823_v58 = vmul.f32 0.2, %v1819_v3 }
 0x3b1   : > { %vm1822_vm13 = vcmp.ge.f32.partialorder %v1820_v14, 0.0  ;;  %v1824_v57 = vmul.f32 0.2, %v1820_v14 }
 0x3b2   : > { %v1825_v26 = vsel %vm1821_vm12, %v1819_v3, %v1823_v58 }
 0x3b3   : > { %v1827_v41 = vadd.f32 %v2068_v61, %v1825_v26  ;;  %v1826_v1 = vsel %vm1822_vm13, %v1820_v14, %v1824_v57 }
 0x3b4   : > { %v1828_v39 = vadd.f32 %v2069_v38, %v1826_v1 }
 0x3b5   : > { %1829 = vst [vmem:[%s305_s13] sm:$0xff] %v1827_v41 }
 0x3b6   : > { %1830 = vst [vmem:[%s305_s13 + $0x8] sm:$0xff] %v1828_v39 }
 0x3b7 PF: > { %s18_s27 = sadd.s32 1, %s2076_s27  }
 0x3b8   : > { %p15_p4 = scmp.ge.s32.totalorder %s18_s27, 4  }
 0x3ba   :  { %17 = sbr.rel (!%p15_p4) target bundleno = 1 (0x1), region = 105 }

</bundles_post_ra>
